<compile_context>
chip_gen: v7x
topology: tpu7x:2x2x1
jax: 0.10.0
libtpu: 0.0.40
codegen_flags: <defaults>
</compile_context>

<pallas_src>
import jax
import jax.numpy as jnp
from jax import lax
from jax.experimental import pallas as pl
from jax.experimental.pallas import tpu as pltpu


def _round_up(x, m):
    return (x + m - 1) // m * m


def birnn_kernel(lens_ref,
                 gi_rf_ref, gi_zf_ref, gi_nf_ref,
                 gi_rb_ref, gi_zb_ref, gi_nb_ref,
                 whr_f_ref, whz_f_ref, whn_f_ref, bhn_f_ref,
                 whr_b_ref, whz_b_ref, whn_b_ref, bhn_b_ref,
                 wfc_b_ref, wfc_f_ref, bfc_ref,
                 out_ref):
    T, B, H = gi_rf_ref.shape
    lens = lens_ref[...]                                   # (B, 1) int32

    # Hoist weight / bias loads (and their broadcasts) out of the time loop.
    whr_f = whr_f_ref[...]; whz_f = whz_f_ref[...]; whn_f = whn_f_ref[...]
    whr_b = whr_b_ref[...]; whz_b = whz_b_ref[...]; whn_b = whn_b_ref[...]
    bhn_f = jnp.broadcast_to(bhn_f_ref[...], (B, H))
    bhn_b = jnp.broadcast_to(bhn_b_ref[...], (B, H))

    def gru_step(h, g_r, g_z, g_n, whr, whz, whn, bhn):
        # g_* already contain x @ W_i* + b_i* (+ b_h* for r,z) from the wrapper.
        r = jax.nn.sigmoid(g_r + jnp.dot(h, whr, preferred_element_type=jnp.float32))
        z = jax.nn.sigmoid(g_z + jnp.dot(h, whz, preferred_element_type=jnp.float32))
        n = jnp.tanh(g_n + r * (jnp.dot(h, whn, preferred_element_type=jnp.float32) + bhn))
        return (1.0 - z) * n + z * h

    def body(t, carry):
        hf, hb = carry
        # forward direction at time t
        hf_new = gru_step(hf, gi_rf_ref[t], gi_zf_ref[t], gi_nf_ref[t],
                          whr_f, whz_f, whn_f, bhn_f)
        hf = jnp.where(t < lens, hf_new, hf)
        # backward direction at time T-1-t (independent chain; interleaved so
        # the two MXU/EUP dependency chains hide each other's latency)
        tb = T - 1 - t
        hb_new = gru_step(hb, gi_rb_ref[tb], gi_zb_ref[tb], gi_nb_ref[tb],
                          whr_b, whz_b, whn_b, bhn_b)
        hb = jnp.where(tb < lens, hb_new, hb)
        return hf, hb

    h0 = jnp.zeros((B, H), jnp.float32)
    hf, hb = lax.fori_loop(0, T, body, (h0, h0), unroll=True)

    # fc on concat([h_bwd, h_fwd]) without a lane concat: two dots, one result.
    out_ref[...] = (jnp.dot(hb, wfc_b_ref[...], preferred_element_type=jnp.float32)
                    + jnp.dot(hf, wfc_f_ref[...], preferred_element_type=jnp.float32)
                    + bfc_ref[...])


def rnn_classification_forward(tokens, seq_lengths, params):
    """tokens: (B, T) int32, seq_lengths: (B,) int32. Returns (B, output_size)."""
    B, T = tokens.shape
    H = params["emb"].shape[1]
    O = params["w_fc"].shape[1]
    B_pad = _round_up(B, 8)          # sublane-friendly batch
    O_pad = _round_up(O, 128)        # lane-dense output store

    # input.t() -> (T, B); embedding lookup (gather) as JAX glue.
    emb = jnp.take(params["emb"], tokens.T, axis=0)                  # (T, B, H)
    emb = jnp.pad(emb, ((0, 0), (0, B_pad - B), (0, 0)))             # (T, Bp, H)
    lens = jnp.pad(seq_lengths.astype(jnp.int32), (0, B_pad - B))
    lens = lens.reshape(B_pad, 1)                                    # padded rows: len=0

    # Hoisted input projection: one (T*Bp, H) x (H, 3H) matmul per direction,
    # biases folded (b_ih for all gates; b_hh for r,z; b_hn stays in-kernel).
    emb2d = emb.reshape(T * B_pad, H)

    def input_proj(w_ih, b_ih, b_hh):
        b = jnp.concatenate([b_ih[:, :2 * H] + b_hh[:, :2 * H], b_ih[:, 2 * H:]], axis=1)
        gi = (emb2d @ w_ih + b).reshape(T, B_pad, 3 * H)
        return gi[..., 0:H], gi[..., H:2 * H], gi[..., 2 * H:3 * H]

    gi_rf, gi_zf, gi_nf = input_proj(params["w_ih_f"], params["b_ih_f"], params["b_hh_f"])
    gi_rb, gi_zb, gi_nb = input_proj(params["w_ih_b"], params["b_ih_b"], params["b_hh_b"])

    # Per-gate recurrent weights (H, H): lane-aligned gate outputs in the kernel.
    def split_hh(w_hh, b_hh):
        return (w_hh[:, 0:H], w_hh[:, H:2 * H], w_hh[:, 2 * H:3 * H], b_hh[:, 2 * H:3 * H])

    whr_f, whz_f, whn_f, bhn_f = split_hh(params["w_hh_f"], params["b_hh_f"])
    whr_b, whz_b, whn_b, bhn_b = split_hh(params["w_hh_b"], params["b_hh_b"])

    # Split + lane-pad the fc: rows 0:H multiply h_bwd, H:2H multiply h_fwd.
    w_fc = params["w_fc"]
    wfc_b = jnp.pad(w_fc[0:H, :], ((0, 0), (0, O_pad - O)))
    wfc_f = jnp.pad(w_fc[H:2 * H, :], ((0, 0), (0, O_pad - O)))
    bfc = jnp.pad(params["b_fc"], ((0, 0), (0, O_pad - O)))

    vmem = pl.BlockSpec(memory_space=pltpu.MemorySpace.VMEM)
    out = pl.pallas_call(
        birnn_kernel,
        out_shape=jax.ShapeDtypeStruct((B_pad, O_pad), jnp.float32),
        in_specs=[vmem] * 18,
        out_specs=vmem,
    )(
        lens,
        gi_rf, gi_zf, gi_nf, gi_rb, gi_zb, gi_nb,
        whr_f, whz_f, whn_f, bhn_f,
        whr_b, whz_b, whn_b, bhn_b,
        wfc_b, wfc_f, bfc,
    )
    return out[:B, :O]


def _reference_forward(tokens, seq_lengths, params):
    """Pure-JAX reference with the original packed-weight GRU math."""
    B, T = tokens.shape
    H = params["emb"].shape[1]
    emb = jnp.take(params["emb"], tokens.T, axis=0)                  # (T, B, H)
    lens = seq_lengths.astype(jnp.int32)

    def gru_cell(x, h, w_ih, w_hh, b_ih, b_hh):
        gi = x @ w_ih + b_ih
        gh = h @ w_hh + b_hh
        i_r, i_z, i_n = gi[:, 0:H], gi[:, H:2 * H], gi[:, 2 * H:3 * H]
        h_r, h_z, h_n = gh[:, 0:H], gh[:, H:2 * H], gh[:, 2 * H:3 * H]
        r = jax.nn.sigmoid(i_r + h_r)
        z = jax.nn.sigmoid(i_z + h_z)
        n = jnp.tanh(i_n + r * h_n)
        return (1.0 - z) * n + z * h

    h_f = jnp.zeros((B, H), jnp.float32)
    for t in range(T):
        h_new = gru_cell(emb[t], h_f, params["w_ih_f"], params["w_hh_f"],
                         params["b_ih_f"], params["b_hh_f"])
        h_f = jnp.where((t < lens)[:, None], h_new, h_f)

    h_b = jnp.zeros((B, H), jnp.float32)
    for t in range(T - 1, -1, -1):
        h_new = gru_cell(emb[t], h_b, params["w_ih_b"], params["w_hh_b"],
                         params["b_ih_b"], params["b_hh_b"])
        h_b = jnp.where((t < lens)[:, None], h_new, h_b)

    hidden_cat = jnp.concatenate([h_b, h_f], axis=1)
    return hidden_cat @ params["w_fc"] + params["b_fc"]


def init_params(key, input_size, hidden_size, output_size):
    H = hidden_size
    ks = jax.random.split(key, 12)
    s = 1.0 / jnp.sqrt(jnp.float32(H))
    u = lambda k, shape: jax.random.uniform(k, shape, jnp.float32, -s, s)
    return {
        "emb":    jax.random.normal(ks[0], (input_size, H), jnp.float32),
        # GRU weights stored transposed: (H, 3H) so projections are x @ W.
        "w_ih_f": u(ks[1], (H, 3 * H)),
        "w_hh_f": u(ks[2], (H, 3 * H)),
        "b_ih_f": u(ks[3], (1, 3 * H)),
        "b_hh_f": u(ks[4], (1, 3 * H)),
        "w_ih_b": u(ks[5], (H, 3 * H)),
        "w_hh_b": u(ks[6], (H, 3 * H)),
        "b_ih_b": u(ks[7], (1, 3 * H)),
        "b_hh_b": u(ks[8], (1, 3 * H)),
        # fc: Linear(2H, O) stored as (2H, O) (= torch weight.T), bias (1, O).
        "w_fc":   u(ks[9], (2 * H, output_size)),
        "b_fc":   u(ks[10], (1, output_size)),
    }


if __name__ == "__main__":
    INPUT_SIZE = 32      # vocab size for the Embedding
    HIDDEN_SIZE = 32
    OUTPUT_SIZE = 8
    BATCH = 4
    SEQ_LEN = 8          # padded sequence length

    key = jax.random.PRNGKey(0)
    kp, kt = jax.random.split(key)
    params = init_params(kp, INPUT_SIZE, HIDDEN_SIZE, OUTPUT_SIZE)

    tokens = jax.random.randint(kt, (BATCH, SEQ_LEN), 0, INPUT_SIZE, jnp.int32)
    # pack_padded_sequence expects descending lengths.
    seq_lengths = jnp.array([8, 6, 5, 3], dtype=jnp.int32)

    fwd = jax.jit(rnn_classification_forward)
    out = fwd(tokens, seq_lengths, params)
    jax.block_until_ready(out)

    ref = _reference_forward(tokens, seq_lengths, params)
    assert out.shape == (BATCH, OUTPUT_SIZE)
    assert jnp.allclose(out, ref, atol=1e-4, rtol=1e-4), "mismatch vs reference"

    print("KERNEL_OK")
</pallas_src>

<mosaic_0001>
module attributes {stable_mosaic.version = 11 : i64} {
  func.func @birnn_kernel(%arg0: memref<8x1xi32, #tpu.memory_space<vmem>>, %arg1: memref<8x8x32xf32, #tpu.memory_space<vmem>>, %arg2: memref<8x8x32xf32, #tpu.memory_space<vmem>>, %arg3: memref<8x8x32xf32, #tpu.memory_space<vmem>>, %arg4: memref<8x8x32xf32, #tpu.memory_space<vmem>>, %arg5: memref<8x8x32xf32, #tpu.memory_space<vmem>>, %arg6: memref<8x8x32xf32, #tpu.memory_space<vmem>>, %arg7: memref<32x32xf32, #tpu.memory_space<vmem>>, %arg8: memref<32x32xf32, #tpu.memory_space<vmem>>, %arg9: memref<32x32xf32, #tpu.memory_space<vmem>>, %arg10: memref<1x32xf32, #tpu.memory_space<vmem>>, %arg11: memref<32x32xf32, #tpu.memory_space<vmem>>, %arg12: memref<32x32xf32, #tpu.memory_space<vmem>>, %arg13: memref<32x32xf32, #tpu.memory_space<vmem>>, %arg14: memref<1x32xf32, #tpu.memory_space<vmem>>, %arg15: memref<32x128xf32, #tpu.memory_space<vmem>>, %arg16: memref<32x128xf32, #tpu.memory_space<vmem>>, %arg17: memref<1x128xf32, #tpu.memory_space<vmem>>, %arg18: memref<8x128xf32, #tpu.memory_space<vmem>>) attributes {dimension_semantics = [], scalar_prefetch = 0 : i64, scratch_operands = 0 : i64, tpu.core_type = #tpu.core_type<tc>} {
    %c0 = arith.constant 0 : index
    %c0_0 = arith.constant 0 : index
    %0 = vector.load %arg0[%c0, %c0_0] : memref<8x1xi32, #tpu.memory_space<vmem>>, vector<8x1xi32>
    %c0_1 = arith.constant 0 : index
    %c0_2 = arith.constant 0 : index
    %1 = vector.load %arg7[%c0_1, %c0_2] : memref<32x32xf32, #tpu.memory_space<vmem>>, vector<32x32xf32>
    %c0_3 = arith.constant 0 : index
    %c0_4 = arith.constant 0 : index
    %2 = vector.load %arg8[%c0_3, %c0_4] : memref<32x32xf32, #tpu.memory_space<vmem>>, vector<32x32xf32>
    %c0_5 = arith.constant 0 : index
    %c0_6 = arith.constant 0 : index
    %3 = vector.load %arg9[%c0_5, %c0_6] : memref<32x32xf32, #tpu.memory_space<vmem>>, vector<32x32xf32>
    %c0_7 = arith.constant 0 : index
    %c0_8 = arith.constant 0 : index
    %4 = vector.load %arg11[%c0_7, %c0_8] : memref<32x32xf32, #tpu.memory_space<vmem>>, vector<32x32xf32>
    %c0_9 = arith.constant 0 : index
    %c0_10 = arith.constant 0 : index
    %5 = vector.load %arg12[%c0_9, %c0_10] : memref<32x32xf32, #tpu.memory_space<vmem>>, vector<32x32xf32>
    %c0_11 = arith.constant 0 : index
    %c0_12 = arith.constant 0 : index
    %6 = vector.load %arg13[%c0_11, %c0_12] : memref<32x32xf32, #tpu.memory_space<vmem>>, vector<32x32xf32>
    %c0_13 = arith.constant 0 : index
    %c0_14 = arith.constant 0 : index
    %7 = vector.load %arg10[%c0_13, %c0_14] : memref<1x32xf32, #tpu.memory_space<vmem>>, vector<1x32xf32>
    %8 = vector.shape_cast %7 : vector<1x32xf32> to vector<1x32xf32>
    %9 = vector.broadcast %8 : vector<1x32xf32> to vector<8x32xf32>
    %c0_15 = arith.constant 0 : index
    %c0_16 = arith.constant 0 : index
    %10 = vector.load %arg14[%c0_15, %c0_16] : memref<1x32xf32, #tpu.memory_space<vmem>>, vector<1x32xf32>
    %11 = vector.shape_cast %10 : vector<1x32xf32> to vector<1x32xf32>
    %12 = vector.broadcast %11 : vector<1x32xf32> to vector<8x32xf32>
    %cst = arith.constant 0.000000e+00 : f32
    %13 = vector.broadcast %cst : f32 to vector<8x32xf32>
    %c0_i32 = arith.constant 0 : i32
    %14 = arith.index_cast %c0_i32 : i32 to index
    %c0_17 = arith.constant 0 : index
    %c0_18 = arith.constant 0 : index
    %15 = vector.load %arg1[%14, %c0_17, %c0_18] : memref<8x8x32xf32, #tpu.memory_space<vmem>>, vector<1x8x32xf32>
    %16 = vector.shape_cast %15 : vector<1x8x32xf32> to vector<8x32xf32>
    %17 = arith.index_cast %c0_i32 : i32 to index
    %c0_19 = arith.constant 0 : index
    %c0_20 = arith.constant 0 : index
    %18 = vector.load %arg2[%17, %c0_19, %c0_20] : memref<8x8x32xf32, #tpu.memory_space<vmem>>, vector<1x8x32xf32>
    %19 = vector.shape_cast %18 : vector<1x8x32xf32> to vector<8x32xf32>
    %20 = arith.index_cast %c0_i32 : i32 to index
    %c0_21 = arith.constant 0 : index
    %c0_22 = arith.constant 0 : index
    %21 = vector.load %arg3[%20, %c0_21, %c0_22] : memref<8x8x32xf32, #tpu.memory_space<vmem>>, vector<1x8x32xf32>
    %22 = vector.shape_cast %21 : vector<1x8x32xf32> to vector<8x32xf32>
    %cst_23 = arith.constant dense<0.000000e+00> : vector<8x32xf32>
    %23 = tpu.matmul %13, %1, %cst_23 {dimension_numbers = #tpu.dot_dimension_numbers<[1], [0], [0], [1], [0, 0, 1, 1], [], []>} : vector<8x32xf32>, vector<32x32xf32>, vector<8x32xf32> -> vector<8x32xf32>
    %24 = arith.addf %16, %23 : vector<8x32xf32>
    %25 = arith.negf %24 : vector<8x32xf32>
    %26 = math.exp %25 : vector<8x32xf32>
    %cst_24 = arith.constant 1.000000e+00 : f32
    %27 = vector.broadcast %cst_24 : f32 to vector<8x32xf32>
    %28 = arith.addf %27, %26 : vector<8x32xf32>
    %29 = arith.divf %27, %28 : vector<8x32xf32>
    %cst_25 = arith.constant dense<0.000000e+00> : vector<8x32xf32>
    %30 = tpu.matmul %13, %2, %cst_25 {dimension_numbers = #tpu.dot_dimension_numbers<[1], [0], [0], [1], [0, 0, 1, 1], [], []>} : vector<8x32xf32>, vector<32x32xf32>, vector<8x32xf32> -> vector<8x32xf32>
    %31 = arith.addf %19, %30 : vector<8x32xf32>
    %32 = arith.negf %31 : vector<8x32xf32>
    %33 = math.exp %32 : vector<8x32xf32>
    %cst_26 = arith.constant 1.000000e+00 : f32
    %34 = vector.broadcast %cst_26 : f32 to vector<8x32xf32>
    %35 = arith.addf %34, %33 : vector<8x32xf32>
    %36 = arith.divf %34, %35 : vector<8x32xf32>
    %cst_27 = arith.constant dense<0.000000e+00> : vector<8x32xf32>
    %37 = tpu.matmul %13, %3, %cst_27 {dimension_numbers = #tpu.dot_dimension_numbers<[1], [0], [0], [1], [0, 0, 1, 1], [], []>} : vector<8x32xf32>, vector<32x32xf32>, vector<8x32xf32> -> vector<8x32xf32>
    %38 = arith.addf %37, %9 : vector<8x32xf32>
    %39 = arith.mulf %29, %38 : vector<8x32xf32>
    %40 = arith.addf %22, %39 : vector<8x32xf32>
    %41 = math.tanh %40 : vector<8x32xf32>
    %cst_28 = arith.constant 1.000000e+00 : f32
    %42 = vector.broadcast %cst_28 : f32 to vector<8x32xf32>
    %43 = arith.subf %42, %36 : vector<8x32xf32>
    %44 = arith.mulf %43, %41 : vector<8x32xf32>
    %45 = arith.mulf %36, %13 : vector<8x32xf32>
    %46 = arith.addf %44, %45 : vector<8x32xf32>
    %47 = vector.broadcast %c0_i32 : i32 to vector<8x1xi32>
    %48 = arith.cmpi slt, %47, %0 : vector<8x1xi32>
    %49 = vector.shape_cast %48 : vector<8x1xi1> to vector<8x1xi1>
    %50 = vector.broadcast %49 : vector<8x1xi1> to vector<8x32xi1>
    %51 = arith.select %50, %46, %13 : vector<8x32xi1>, vector<8x32xf32>
    %c7_i32 = arith.constant 7 : i32
    %52 = arith.subi %c7_i32, %c0_i32 : i32
    %53 = arith.index_cast %52 : i32 to index
    %c0_29 = arith.constant 0 : index
    %c0_30 = arith.constant 0 : index
    %54 = vector.load %arg4[%53, %c0_29, %c0_30] : memref<8x8x32xf32, #tpu.memory_space<vmem>>, vector<1x8x32xf32>
    %55 = vector.shape_cast %54 : vector<1x8x32xf32> to vector<8x32xf32>
    %56 = arith.index_cast %52 : i32 to index
    %c0_31 = arith.constant 0 : index
    %c0_32 = arith.constant 0 : index
    %57 = vector.load %arg5[%56, %c0_31, %c0_32] : memref<8x8x32xf32, #tpu.memory_space<vmem>>, vector<1x8x32xf32>
    %58 = vector.shape_cast %57 : vector<1x8x32xf32> to vector<8x32xf32>
    %59 = arith.index_cast %52 : i32 to index
    %c0_33 = arith.constant 0 : index
    %c0_34 = arith.constant 0 : index
    %60 = vector.load %arg6[%59, %c0_33, %c0_34] : memref<8x8x32xf32, #tpu.memory_space<vmem>>, vector<1x8x32xf32>
    %61 = vector.shape_cast %60 : vector<1x8x32xf32> to vector<8x32xf32>
    %cst_35 = arith.constant dense<0.000000e+00> : vector<8x32xf32>
    %62 = tpu.matmul %13, %4, %cst_35 {dimension_numbers = #tpu.dot_dimension_numbers<[1], [0], [0], [1], [0, 0, 1, 1], [], []>} : vector<8x32xf32>, vector<32x32xf32>, vector<8x32xf32> -> vector<8x32xf32>
    %63 = arith.addf %55, %62 : vector<8x32xf32>
    %64 = arith.negf %63 : vector<8x32xf32>
    %65 = math.exp %64 : vector<8x32xf32>
    %cst_36 = arith.constant 1.000000e+00 : f32
    %66 = vector.broadcast %cst_36 : f32 to vector<8x32xf32>
    %67 = arith.addf %66, %65 : vector<8x32xf32>
    %68 = arith.divf %66, %67 : vector<8x32xf32>
    %cst_37 = arith.constant dense<0.000000e+00> : vector<8x32xf32>
    %69 = tpu.matmul %13, %5, %cst_37 {dimension_numbers = #tpu.dot_dimension_numbers<[1], [0], [0], [1], [0, 0, 1, 1], [], []>} : vector<8x32xf32>, vector<32x32xf32>, vector<8x32xf32> -> vector<8x32xf32>
    %70 = arith.addf %58, %69 : vector<8x32xf32>
    %71 = arith.negf %70 : vector<8x32xf32>
    %72 = math.exp %71 : vector<8x32xf32>
    %cst_38 = arith.constant 1.000000e+00 : f32
    %73 = vector.broadcast %cst_38 : f32 to vector<8x32xf32>
    %74 = arith.addf %73, %72 : vector<8x32xf32>
    %75 = arith.divf %73, %74 : vector<8x32xf32>
    %cst_39 = arith.constant dense<0.000000e+00> : vector<8x32xf32>
    %76 = tpu.matmul %13, %6, %cst_39 {dimension_numbers = #tpu.dot_dimension_numbers<[1], [0], [0], [1], [0, 0, 1, 1], [], []>} : vector<8x32xf32>, vector<32x32xf32>, vector<8x32xf32> -> vector<8x32xf32>
    %77 = arith.addf %76, %12 : vector<8x32xf32>
    %78 = arith.mulf %68, %77 : vector<8x32xf32>
    %79 = arith.addf %61, %78 : vector<8x32xf32>
    %80 = math.tanh %79 : vector<8x32xf32>
    %cst_40 = arith.constant 1.000000e+00 : f32
    %81 = vector.broadcast %cst_40 : f32 to vector<8x32xf32>
    %82 = arith.subf %81, %75 : vector<8x32xf32>
    %83 = arith.mulf %82, %80 : vector<8x32xf32>
    %84 = arith.mulf %75, %13 : vector<8x32xf32>
    %85 = arith.addf %83, %84 : vector<8x32xf32>
    %86 = vector.broadcast %52 : i32 to vector<8x1xi32>
    %87 = arith.cmpi slt, %86, %0 : vector<8x1xi32>
    %88 = vector.shape_cast %87 : vector<8x1xi1> to vector<8x1xi1>
    %89 = vector.broadcast %88 : vector<8x1xi1> to vector<8x32xi1>
    %90 = arith.select %89, %85, %13 : vector<8x32xi1>, vector<8x32xf32>
    %c1_i32 = arith.constant 1 : i32
    %91 = arith.index_cast %c1_i32 : i32 to index
    %c0_41 = arith.constant 0 : index
    %c0_42 = arith.constant 0 : index
    %92 = vector.load %arg1[%91, %c0_41, %c0_42] : memref<8x8x32xf32, #tpu.memory_space<vmem>>, vector<1x8x32xf32>
    %93 = vector.shape_cast %92 : vector<1x8x32xf32> to vector<8x32xf32>
    %94 = arith.index_cast %c1_i32 : i32 to index
    %c0_43 = arith.constant 0 : index
    %c0_44 = arith.constant 0 : index
    %95 = vector.load %arg2[%94, %c0_43, %c0_44] : memref<8x8x32xf32, #tpu.memory_space<vmem>>, vector<1x8x32xf32>
    %96 = vector.shape_cast %95 : vector<1x8x32xf32> to vector<8x32xf32>
    %97 = arith.index_cast %c1_i32 : i32 to index
    %c0_45 = arith.constant 0 : index
    %c0_46 = arith.constant 0 : index
    %98 = vector.load %arg3[%97, %c0_45, %c0_46] : memref<8x8x32xf32, #tpu.memory_space<vmem>>, vector<1x8x32xf32>
    %99 = vector.shape_cast %98 : vector<1x8x32xf32> to vector<8x32xf32>
    %cst_47 = arith.constant dense<0.000000e+00> : vector<8x32xf32>
    %100 = tpu.matmul %51, %1, %cst_47 {dimension_numbers = #tpu.dot_dimension_numbers<[1], [0], [0], [1], [0, 0, 1, 1], [], []>} : vector<8x32xf32>, vector<32x32xf32>, vector<8x32xf32> -> vector<8x32xf32>
    %101 = arith.addf %93, %100 : vector<8x32xf32>
    %102 = arith.negf %101 : vector<8x32xf32>
    %103 = math.exp %102 : vector<8x32xf32>
    %cst_48 = arith.constant 1.000000e+00 : f32
    %104 = vector.broadcast %cst_48 : f32 to vector<8x32xf32>
    %105 = arith.addf %104, %103 : vector<8x32xf32>
    %106 = arith.divf %104, %105 : vector<8x32xf32>
    %cst_49 = arith.constant dense<0.000000e+00> : vector<8x32xf32>
    %107 = tpu.matmul %51, %2, %cst_49 {dimension_numbers = #tpu.dot_dimension_numbers<[1], [0], [0], [1], [0, 0, 1, 1], [], []>} : vector<8x32xf32>, vector<32x32xf32>, vector<8x32xf32> -> vector<8x32xf32>
    %108 = arith.addf %96, %107 : vector<8x32xf32>
    %109 = arith.negf %108 : vector<8x32xf32>
    %110 = math.exp %109 : vector<8x32xf32>
    %cst_50 = arith.constant 1.000000e+00 : f32
    %111 = vector.broadcast %cst_50 : f32 to vector<8x32xf32>
    %112 = arith.addf %111, %110 : vector<8x32xf32>
    %113 = arith.divf %111, %112 : vector<8x32xf32>
    %cst_51 = arith.constant dense<0.000000e+00> : vector<8x32xf32>
    %114 = tpu.matmul %51, %3, %cst_51 {dimension_numbers = #tpu.dot_dimension_numbers<[1], [0], [0], [1], [0, 0, 1, 1], [], []>} : vector<8x32xf32>, vector<32x32xf32>, vector<8x32xf32> -> vector<8x32xf32>
    %115 = arith.addf %114, %9 : vector<8x32xf32>
    %116 = arith.mulf %106, %115 : vector<8x32xf32>
    %117 = arith.addf %99, %116 : vector<8x32xf32>
    %118 = math.tanh %117 : vector<8x32xf32>
    %cst_52 = arith.constant 1.000000e+00 : f32
    %119 = vector.broadcast %cst_52 : f32 to vector<8x32xf32>
    %120 = arith.subf %119, %113 : vector<8x32xf32>
    %121 = arith.mulf %120, %118 : vector<8x32xf32>
    %122 = arith.mulf %113, %51 : vector<8x32xf32>
    %123 = arith.addf %121, %122 : vector<8x32xf32>
    %124 = vector.broadcast %c1_i32 : i32 to vector<8x1xi32>
    %125 = arith.cmpi slt, %124, %0 : vector<8x1xi32>
    %126 = vector.shape_cast %125 : vector<8x1xi1> to vector<8x1xi1>
    %127 = vector.broadcast %126 : vector<8x1xi1> to vector<8x32xi1>
    %128 = arith.select %127, %123, %51 : vector<8x32xi1>, vector<8x32xf32>
    %c7_i32_53 = arith.constant 7 : i32
    %129 = arith.subi %c7_i32_53, %c1_i32 : i32
    %130 = arith.index_cast %129 : i32 to index
    %c0_54 = arith.constant 0 : index
    %c0_55 = arith.constant 0 : index
    %131 = vector.load %arg4[%130, %c0_54, %c0_55] : memref<8x8x32xf32, #tpu.memory_space<vmem>>, vector<1x8x32xf32>
    %132 = vector.shape_cast %131 : vector<1x8x32xf32> to vector<8x32xf32>
    %133 = arith.index_cast %129 : i32 to index
    %c0_56 = arith.constant 0 : index
    %c0_57 = arith.constant 0 : index
    %134 = vector.load %arg5[%133, %c0_56, %c0_57] : memref<8x8x32xf32, #tpu.memory_space<vmem>>, vector<1x8x32xf32>
    %135 = vector.shape_cast %134 : vector<1x8x32xf32> to vector<8x32xf32>
    %136 = arith.index_cast %129 : i32 to index
    %c0_58 = arith.constant 0 : index
    %c0_59 = arith.constant 0 : index
    %137 = vector.load %arg6[%136, %c0_58, %c0_59] : memref<8x8x32xf32, #tpu.memory_space<vmem>>, vector<1x8x32xf32>
    %138 = vector.shape_cast %137 : vector<1x8x32xf32> to vector<8x32xf32>
    %cst_60 = arith.constant dense<0.000000e+00> : vector<8x32xf32>
    %139 = tpu.matmul %90, %4, %cst_60 {dimension_numbers = #tpu.dot_dimension_numbers<[1], [0], [0], [1], [0, 0, 1, 1], [], []>} : vector<8x32xf32>, vector<32x32xf32>, vector<8x32xf32> -> vector<8x32xf32>
    %140 = arith.addf %132, %139 : vector<8x32xf32>
    %141 = arith.negf %140 : vector<8x32xf32>
    %142 = math.exp %141 : vector<8x32xf32>
    %cst_61 = arith.constant 1.000000e+00 : f32
    %143 = vector.broadcast %cst_61 : f32 to vector<8x32xf32>
    %144 = arith.addf %143, %142 : vector<8x32xf32>
    %145 = arith.divf %143, %144 : vector<8x32xf32>
    %cst_62 = arith.constant dense<0.000000e+00> : vector<8x32xf32>
    %146 = tpu.matmul %90, %5, %cst_62 {dimension_numbers = #tpu.dot_dimension_numbers<[1], [0], [0], [1], [0, 0, 1, 1], [], []>} : vector<8x32xf32>, vector<32x32xf32>, vector<8x32xf32> -> vector<8x32xf32>
    %147 = arith.addf %135, %146 : vector<8x32xf32>
    %148 = arith.negf %147 : vector<8x32xf32>
    %149 = math.exp %148 : vector<8x32xf32>
    %cst_63 = arith.constant 1.000000e+00 : f32
    %150 = vector.broadcast %cst_63 : f32 to vector<8x32xf32>
    %151 = arith.addf %150, %149 : vector<8x32xf32>
    %152 = arith.divf %150, %151 : vector<8x32xf32>
    %cst_64 = arith.constant dense<0.000000e+00> : vector<8x32xf32>
    %153 = tpu.matmul %90, %6, %cst_64 {dimension_numbers = #tpu.dot_dimension_numbers<[1], [0], [0], [1], [0, 0, 1, 1], [], []>} : vector<8x32xf32>, vector<32x32xf32>, vector<8x32xf32> -> vector<8x32xf32>
    %154 = arith.addf %153, %12 : vector<8x32xf32>
    %155 = arith.mulf %145, %154 : vector<8x32xf32>
    %156 = arith.addf %138, %155 : vector<8x32xf32>
    %157 = math.tanh %156 : vector<8x32xf32>
    %cst_65 = arith.constant 1.000000e+00 : f32
    %158 = vector.broadcast %cst_65 : f32 to vector<8x32xf32>
    %159 = arith.subf %158, %152 : vector<8x32xf32>
    %160 = arith.mulf %159, %157 : vector<8x32xf32>
    %161 = arith.mulf %152, %90 : vector<8x32xf32>
    %162 = arith.addf %160, %161 : vector<8x32xf32>
    %163 = vector.broadcast %129 : i32 to vector<8x1xi32>
    %164 = arith.cmpi slt, %163, %0 : vector<8x1xi32>
    %165 = vector.shape_cast %164 : vector<8x1xi1> to vector<8x1xi1>
    %166 = vector.broadcast %165 : vector<8x1xi1> to vector<8x32xi1>
    %167 = arith.select %166, %162, %90 : vector<8x32xi1>, vector<8x32xf32>
    %c2_i32 = arith.constant 2 : i32
    %168 = arith.index_cast %c2_i32 : i32 to index
    %c0_66 = arith.constant 0 : index
    %c0_67 = arith.constant 0 : index
    %169 = vector.load %arg1[%168, %c0_66, %c0_67] : memref<8x8x32xf32, #tpu.memory_space<vmem>>, vector<1x8x32xf32>
    %170 = vector.shape_cast %169 : vector<1x8x32xf32> to vector<8x32xf32>
    %171 = arith.index_cast %c2_i32 : i32 to index
    %c0_68 = arith.constant 0 : index
    %c0_69 = arith.constant 0 : index
    %172 = vector.load %arg2[%171, %c0_68, %c0_69] : memref<8x8x32xf32, #tpu.memory_space<vmem>>, vector<1x8x32xf32>
    %173 = vector.shape_cast %172 : vector<1x8x32xf32> to vector<8x32xf32>
    %174 = arith.index_cast %c2_i32 : i32 to index
    %c0_70 = arith.constant 0 : index
    %c0_71 = arith.constant 0 : index
    %175 = vector.load %arg3[%174, %c0_70, %c0_71] : memref<8x8x32xf32, #tpu.memory_space<vmem>>, vector<1x8x32xf32>
    %176 = vector.shape_cast %175 : vector<1x8x32xf32> to vector<8x32xf32>
    %cst_72 = arith.constant dense<0.000000e+00> : vector<8x32xf32>
    %177 = tpu.matmul %128, %1, %cst_72 {dimension_numbers = #tpu.dot_dimension_numbers<[1], [0], [0], [1], [0, 0, 1, 1], [], []>} : vector<8x32xf32>, vector<32x32xf32>, vector<8x32xf32> -> vector<8x32xf32>
    %178 = arith.addf %170, %177 : vector<8x32xf32>
    %179 = arith.negf %178 : vector<8x32xf32>
    %180 = math.exp %179 : vector<8x32xf32>
    %cst_73 = arith.constant 1.000000e+00 : f32
    %181 = vector.broadcast %cst_73 : f32 to vector<8x32xf32>
    %182 = arith.addf %181, %180 : vector<8x32xf32>
    %183 = arith.divf %181, %182 : vector<8x32xf32>
    %cst_74 = arith.constant dense<0.000000e+00> : vector<8x32xf32>
    %184 = tpu.matmul %128, %2, %cst_74 {dimension_numbers = #tpu.dot_dimension_numbers<[1], [0], [0], [1], [0, 0, 1, 1], [], []>} : vector<8x32xf32>, vector<32x32xf32>, vector<8x32xf32> -> vector<8x32xf32>
    %185 = arith.addf %173, %184 : vector<8x32xf32>
    %186 = arith.negf %185 : vector<8x32xf32>
    %187 = math.exp %186 : vector<8x32xf32>
    %cst_75 = arith.constant 1.000000e+00 : f32
    %188 = vector.broadcast %cst_75 : f32 to vector<8x32xf32>
    %189 = arith.addf %188, %187 : vector<8x32xf32>
    %190 = arith.divf %188, %189 : vector<8x32xf32>
    %cst_76 = arith.constant dense<0.000000e+00> : vector<8x32xf32>
    %191 = tpu.matmul %128, %3, %cst_76 {dimension_numbers = #tpu.dot_dimension_numbers<[1], [0], [0], [1], [0, 0, 1, 1], [], []>} : vector<8x32xf32>, vector<32x32xf32>, vector<8x32xf32> -> vector<8x32xf32>
    %192 = arith.addf %191, %9 : vector<8x32xf32>
    %193 = arith.mulf %183, %192 : vector<8x32xf32>
    %194 = arith.addf %176, %193 : vector<8x32xf32>
    %195 = math.tanh %194 : vector<8x32xf32>
    %cst_77 = arith.constant 1.000000e+00 : f32
    %196 = vector.broadcast %cst_77 : f32 to vector<8x32xf32>
    %197 = arith.subf %196, %190 : vector<8x32xf32>
    %198 = arith.mulf %197, %195 : vector<8x32xf32>
    %199 = arith.mulf %190, %128 : vector<8x32xf32>
    %200 = arith.addf %198, %199 : vector<8x32xf32>
    %201 = vector.broadcast %c2_i32 : i32 to vector<8x1xi32>
    %202 = arith.cmpi slt, %201, %0 : vector<8x1xi32>
    %203 = vector.shape_cast %202 : vector<8x1xi1> to vector<8x1xi1>
    %204 = vector.broadcast %203 : vector<8x1xi1> to vector<8x32xi1>
    %205 = arith.select %204, %200, %128 : vector<8x32xi1>, vector<8x32xf32>
    %c7_i32_78 = arith.constant 7 : i32
    %206 = arith.subi %c7_i32_78, %c2_i32 : i32
    %207 = arith.index_cast %206 : i32 to index
    %c0_79 = arith.constant 0 : index
    %c0_80 = arith.constant 0 : index
    %208 = vector.load %arg4[%207, %c0_79, %c0_80] : memref<8x8x32xf32, #tpu.memory_space<vmem>>, vector<1x8x32xf32>
    %209 = vector.shape_cast %208 : vector<1x8x32xf32> to vector<8x32xf32>
    %210 = arith.index_cast %206 : i32 to index
    %c0_81 = arith.constant 0 : index
    %c0_82 = arith.constant 0 : index
    %211 = vector.load %arg5[%210, %c0_81, %c0_82] : memref<8x8x32xf32, #tpu.memory_space<vmem>>, vector<1x8x32xf32>
    %212 = vector.shape_cast %211 : vector<1x8x32xf32> to vector<8x32xf32>
    %213 = arith.index_cast %206 : i32 to index
    %c0_83 = arith.constant 0 : index
    %c0_84 = arith.constant 0 : index
    %214 = vector.load %arg6[%213, %c0_83, %c0_84] : memref<8x8x32xf32, #tpu.memory_space<vmem>>, vector<1x8x32xf32>
    %215 = vector.shape_cast %214 : vector<1x8x32xf32> to vector<8x32xf32>
    %cst_85 = arith.constant dense<0.000000e+00> : vector<8x32xf32>
    %216 = tpu.matmul %167, %4, %cst_85 {dimension_numbers = #tpu.dot_dimension_numbers<[1], [0], [0], [1], [0, 0, 1, 1], [], []>} : vector<8x32xf32>, vector<32x32xf32>, vector<8x32xf32> -> vector<8x32xf32>
    %217 = arith.addf %209, %216 : vector<8x32xf32>
    %218 = arith.negf %217 : vector<8x32xf32>
    %219 = math.exp %218 : vector<8x32xf32>
    %cst_86 = arith.constant 1.000000e+00 : f32
    %220 = vector.broadcast %cst_86 : f32 to vector<8x32xf32>
    %221 = arith.addf %220, %219 : vector<8x32xf32>
    %222 = arith.divf %220, %221 : vector<8x32xf32>
    %cst_87 = arith.constant dense<0.000000e+00> : vector<8x32xf32>
    %223 = tpu.matmul %167, %5, %cst_87 {dimension_numbers = #tpu.dot_dimension_numbers<[1], [0], [0], [1], [0, 0, 1, 1], [], []>} : vector<8x32xf32>, vector<32x32xf32>, vector<8x32xf32> -> vector<8x32xf32>
    %224 = arith.addf %212, %223 : vector<8x32xf32>
    %225 = arith.negf %224 : vector<8x32xf32>
    %226 = math.exp %225 : vector<8x32xf32>
    %cst_88 = arith.constant 1.000000e+00 : f32
    %227 = vector.broadcast %cst_88 : f32 to vector<8x32xf32>
    %228 = arith.addf %227, %226 : vector<8x32xf32>
    %229 = arith.divf %227, %228 : vector<8x32xf32>
    %cst_89 = arith.constant dense<0.000000e+00> : vector<8x32xf32>
    %230 = tpu.matmul %167, %6, %cst_89 {dimension_numbers = #tpu.dot_dimension_numbers<[1], [0], [0], [1], [0, 0, 1, 1], [], []>} : vector<8x32xf32>, vector<32x32xf32>, vector<8x32xf32> -> vector<8x32xf32>
    %231 = arith.addf %230, %12 : vector<8x32xf32>
    %232 = arith.mulf %222, %231 : vector<8x32xf32>
    %233 = arith.addf %215, %232 : vector<8x32xf32>
    %234 = math.tanh %233 : vector<8x32xf32>
    %cst_90 = arith.constant 1.000000e+00 : f32
    %235 = vector.broadcast %cst_90 : f32 to vector<8x32xf32>
    %236 = arith.subf %235, %229 : vector<8x32xf32>
    %237 = arith.mulf %236, %234 : vector<8x32xf32>
    %238 = arith.mulf %229, %167 : vector<8x32xf32>
    %239 = arith.addf %237, %238 : vector<8x32xf32>
    %240 = vector.broadcast %206 : i32 to vector<8x1xi32>
    %241 = arith.cmpi slt, %240, %0 : vector<8x1xi32>
    %242 = vector.shape_cast %241 : vector<8x1xi1> to vector<8x1xi1>
    %243 = vector.broadcast %242 : vector<8x1xi1> to vector<8x32xi1>
    %244 = arith.select %243, %239, %167 : vector<8x32xi1>, vector<8x32xf32>
    %c3_i32 = arith.constant 3 : i32
    %245 = arith.index_cast %c3_i32 : i32 to index
    %c0_91 = arith.constant 0 : index
    %c0_92 = arith.constant 0 : index
    %246 = vector.load %arg1[%245, %c0_91, %c0_92] : memref<8x8x32xf32, #tpu.memory_space<vmem>>, vector<1x8x32xf32>
    %247 = vector.shape_cast %246 : vector<1x8x32xf32> to vector<8x32xf32>
    %248 = arith.index_cast %c3_i32 : i32 to index
    %c0_93 = arith.constant 0 : index
    %c0_94 = arith.constant 0 : index
    %249 = vector.load %arg2[%248, %c0_93, %c0_94] : memref<8x8x32xf32, #tpu.memory_space<vmem>>, vector<1x8x32xf32>
    %250 = vector.shape_cast %249 : vector<1x8x32xf32> to vector<8x32xf32>
    %251 = arith.index_cast %c3_i32 : i32 to index
    %c0_95 = arith.constant 0 : index
    %c0_96 = arith.constant 0 : index
    %252 = vector.load %arg3[%251, %c0_95, %c0_96] : memref<8x8x32xf32, #tpu.memory_space<vmem>>, vector<1x8x32xf32>
    %253 = vector.shape_cast %252 : vector<1x8x32xf32> to vector<8x32xf32>
    %cst_97 = arith.constant dense<0.000000e+00> : vector<8x32xf32>
    %254 = tpu.matmul %205, %1, %cst_97 {dimension_numbers = #tpu.dot_dimension_numbers<[1], [0], [0], [1], [0, 0, 1, 1], [], []>} : vector<8x32xf32>, vector<32x32xf32>, vector<8x32xf32> -> vector<8x32xf32>
    %255 = arith.addf %247, %254 : vector<8x32xf32>
    %256 = arith.negf %255 : vector<8x32xf32>
    %257 = math.exp %256 : vector<8x32xf32>
    %cst_98 = arith.constant 1.000000e+00 : f32
    %258 = vector.broadcast %cst_98 : f32 to vector<8x32xf32>
    %259 = arith.addf %258, %257 : vector<8x32xf32>
    %260 = arith.divf %258, %259 : vector<8x32xf32>
    %cst_99 = arith.constant dense<0.000000e+00> : vector<8x32xf32>
    %261 = tpu.matmul %205, %2, %cst_99 {dimension_numbers = #tpu.dot_dimension_numbers<[1], [0], [0], [1], [0, 0, 1, 1], [], []>} : vector<8x32xf32>, vector<32x32xf32>, vector<8x32xf32> -> vector<8x32xf32>
    %262 = arith.addf %250, %261 : vector<8x32xf32>
    %263 = arith.negf %262 : vector<8x32xf32>
    %264 = math.exp %263 : vector<8x32xf32>
    %cst_100 = arith.constant 1.000000e+00 : f32
    %265 = vector.broadcast %cst_100 : f32 to vector<8x32xf32>
    %266 = arith.addf %265, %264 : vector<8x32xf32>
    %267 = arith.divf %265, %266 : vector<8x32xf32>
    %cst_101 = arith.constant dense<0.000000e+00> : vector<8x32xf32>
    %268 = tpu.matmul %205, %3, %cst_101 {dimension_numbers = #tpu.dot_dimension_numbers<[1], [0], [0], [1], [0, 0, 1, 1], [], []>} : vector<8x32xf32>, vector<32x32xf32>, vector<8x32xf32> -> vector<8x32xf32>
    %269 = arith.addf %268, %9 : vector<8x32xf32>
    %270 = arith.mulf %260, %269 : vector<8x32xf32>
    %271 = arith.addf %253, %270 : vector<8x32xf32>
    %272 = math.tanh %271 : vector<8x32xf32>
    %cst_102 = arith.constant 1.000000e+00 : f32
    %273 = vector.broadcast %cst_102 : f32 to vector<8x32xf32>
    %274 = arith.subf %273, %267 : vector<8x32xf32>
    %275 = arith.mulf %274, %272 : vector<8x32xf32>
    %276 = arith.mulf %267, %205 : vector<8x32xf32>
    %277 = arith.addf %275, %276 : vector<8x32xf32>
    %278 = vector.broadcast %c3_i32 : i32 to vector<8x1xi32>
    %279 = arith.cmpi slt, %278, %0 : vector<8x1xi32>
    %280 = vector.shape_cast %279 : vector<8x1xi1> to vector<8x1xi1>
    %281 = vector.broadcast %280 : vector<8x1xi1> to vector<8x32xi1>
    %282 = arith.select %281, %277, %205 : vector<8x32xi1>, vector<8x32xf32>
    %c7_i32_103 = arith.constant 7 : i32
    %283 = arith.subi %c7_i32_103, %c3_i32 : i32
    %284 = arith.index_cast %283 : i32 to index
    %c0_104 = arith.constant 0 : index
    %c0_105 = arith.constant 0 : index
    %285 = vector.load %arg4[%284, %c0_104, %c0_105] : memref<8x8x32xf32, #tpu.memory_space<vmem>>, vector<1x8x32xf32>
    %286 = vector.shape_cast %285 : vector<1x8x32xf32> to vector<8x32xf32>
    %287 = arith.index_cast %283 : i32 to index
    %c0_106 = arith.constant 0 : index
    %c0_107 = arith.constant 0 : index
    %288 = vector.load %arg5[%287, %c0_106, %c0_107] : memref<8x8x32xf32, #tpu.memory_space<vmem>>, vector<1x8x32xf32>
    %289 = vector.shape_cast %288 : vector<1x8x32xf32> to vector<8x32xf32>
    %290 = arith.index_cast %283 : i32 to index
    %c0_108 = arith.constant 0 : index
    %c0_109 = arith.constant 0 : index
    %291 = vector.load %arg6[%290, %c0_108, %c0_109] : memref<8x8x32xf32, #tpu.memory_space<vmem>>, vector<1x8x32xf32>
    %292 = vector.shape_cast %291 : vector<1x8x32xf32> to vector<8x32xf32>
    %cst_110 = arith.constant dense<0.000000e+00> : vector<8x32xf32>
    %293 = tpu.matmul %244, %4, %cst_110 {dimension_numbers = #tpu.dot_dimension_numbers<[1], [0], [0], [1], [0, 0, 1, 1], [], []>} : vector<8x32xf32>, vector<32x32xf32>, vector<8x32xf32> -> vector<8x32xf32>
    %294 = arith.addf %286, %293 : vector<8x32xf32>
    %295 = arith.negf %294 : vector<8x32xf32>
    %296 = math.exp %295 : vector<8x32xf32>
    %cst_111 = arith.constant 1.000000e+00 : f32
    %297 = vector.broadcast %cst_111 : f32 to vector<8x32xf32>
    %298 = arith.addf %297, %296 : vector<8x32xf32>
    %299 = arith.divf %297, %298 : vector<8x32xf32>
    %cst_112 = arith.constant dense<0.000000e+00> : vector<8x32xf32>
    %300 = tpu.matmul %244, %5, %cst_112 {dimension_numbers = #tpu.dot_dimension_numbers<[1], [0], [0], [1], [0, 0, 1, 1], [], []>} : vector<8x32xf32>, vector<32x32xf32>, vector<8x32xf32> -> vector<8x32xf32>
    %301 = arith.addf %289, %300 : vector<8x32xf32>
    %302 = arith.negf %301 : vector<8x32xf32>
    %303 = math.exp %302 : vector<8x32xf32>
    %cst_113 = arith.constant 1.000000e+00 : f32
    %304 = vector.broadcast %cst_113 : f32 to vector<8x32xf32>
    %305 = arith.addf %304, %303 : vector<8x32xf32>
    %306 = arith.divf %304, %305 : vector<8x32xf32>
    %cst_114 = arith.constant dense<0.000000e+00> : vector<8x32xf32>
    %307 = tpu.matmul %244, %6, %cst_114 {dimension_numbers = #tpu.dot_dimension_numbers<[1], [0], [0], [1], [0, 0, 1, 1], [], []>} : vector<8x32xf32>, vector<32x32xf32>, vector<8x32xf32> -> vector<8x32xf32>
    %308 = arith.addf %307, %12 : vector<8x32xf32>
    %309 = arith.mulf %299, %308 : vector<8x32xf32>
    %310 = arith.addf %292, %309 : vector<8x32xf32>
    %311 = math.tanh %310 : vector<8x32xf32>
    %cst_115 = arith.constant 1.000000e+00 : f32
    %312 = vector.broadcast %cst_115 : f32 to vector<8x32xf32>
    %313 = arith.subf %312, %306 : vector<8x32xf32>
    %314 = arith.mulf %313, %311 : vector<8x32xf32>
    %315 = arith.mulf %306, %244 : vector<8x32xf32>
    %316 = arith.addf %314, %315 : vector<8x32xf32>
    %317 = vector.broadcast %283 : i32 to vector<8x1xi32>
    %318 = arith.cmpi slt, %317, %0 : vector<8x1xi32>
    %319 = vector.shape_cast %318 : vector<8x1xi1> to vector<8x1xi1>
    %320 = vector.broadcast %319 : vector<8x1xi1> to vector<8x32xi1>
    %321 = arith.select %320, %316, %244 : vector<8x32xi1>, vector<8x32xf32>
    %c4_i32 = arith.constant 4 : i32
    %322 = arith.index_cast %c4_i32 : i32 to index
    %c0_116 = arith.constant 0 : index
    %c0_117 = arith.constant 0 : index
    %323 = vector.load %arg1[%322, %c0_116, %c0_117] : memref<8x8x32xf32, #tpu.memory_space<vmem>>, vector<1x8x32xf32>
    %324 = vector.shape_cast %323 : vector<1x8x32xf32> to vector<8x32xf32>
    %325 = arith.index_cast %c4_i32 : i32 to index
    %c0_118 = arith.constant 0 : index
    %c0_119 = arith.constant 0 : index
    %326 = vector.load %arg2[%325, %c0_118, %c0_119] : memref<8x8x32xf32, #tpu.memory_space<vmem>>, vector<1x8x32xf32>
    %327 = vector.shape_cast %326 : vector<1x8x32xf32> to vector<8x32xf32>
    %328 = arith.index_cast %c4_i32 : i32 to index
    %c0_120 = arith.constant 0 : index
    %c0_121 = arith.constant 0 : index
    %329 = vector.load %arg3[%328, %c0_120, %c0_121] : memref<8x8x32xf32, #tpu.memory_space<vmem>>, vector<1x8x32xf32>
    %330 = vector.shape_cast %329 : vector<1x8x32xf32> to vector<8x32xf32>
    %cst_122 = arith.constant dense<0.000000e+00> : vector<8x32xf32>
    %331 = tpu.matmul %282, %1, %cst_122 {dimension_numbers = #tpu.dot_dimension_numbers<[1], [0], [0], [1], [0, 0, 1, 1], [], []>} : vector<8x32xf32>, vector<32x32xf32>, vector<8x32xf32> -> vector<8x32xf32>
    %332 = arith.addf %324, %331 : vector<8x32xf32>
    %333 = arith.negf %332 : vector<8x32xf32>
    %334 = math.exp %333 : vector<8x32xf32>
    %cst_123 = arith.constant 1.000000e+00 : f32
    %335 = vector.broadcast %cst_123 : f32 to vector<8x32xf32>
    %336 = arith.addf %335, %334 : vector<8x32xf32>
    %337 = arith.divf %335, %336 : vector<8x32xf32>
    %cst_124 = arith.constant dense<0.000000e+00> : vector<8x32xf32>
    %338 = tpu.matmul %282, %2, %cst_124 {dimension_numbers = #tpu.dot_dimension_numbers<[1], [0], [0], [1], [0, 0, 1, 1], [], []>} : vector<8x32xf32>, vector<32x32xf32>, vector<8x32xf32> -> vector<8x32xf32>
    %339 = arith.addf %327, %338 : vector<8x32xf32>
    %340 = arith.negf %339 : vector<8x32xf32>
    %341 = math.exp %340 : vector<8x32xf32>
    %cst_125 = arith.constant 1.000000e+00 : f32
    %342 = vector.broadcast %cst_125 : f32 to vector<8x32xf32>
    %343 = arith.addf %342, %341 : vector<8x32xf32>
    %344 = arith.divf %342, %343 : vector<8x32xf32>
    %cst_126 = arith.constant dense<0.000000e+00> : vector<8x32xf32>
    %345 = tpu.matmul %282, %3, %cst_126 {dimension_numbers = #tpu.dot_dimension_numbers<[1], [0], [0], [1], [0, 0, 1, 1], [], []>} : vector<8x32xf32>, vector<32x32xf32>, vector<8x32xf32> -> vector<8x32xf32>
    %346 = arith.addf %345, %9 : vector<8x32xf32>
    %347 = arith.mulf %337, %346 : vector<8x32xf32>
    %348 = arith.addf %330, %347 : vector<8x32xf32>
    %349 = math.tanh %348 : vector<8x32xf32>
    %cst_127 = arith.constant 1.000000e+00 : f32
    %350 = vector.broadcast %cst_127 : f32 to vector<8x32xf32>
    %351 = arith.subf %350, %344 : vector<8x32xf32>
    %352 = arith.mulf %351, %349 : vector<8x32xf32>
    %353 = arith.mulf %344, %282 : vector<8x32xf32>
    %354 = arith.addf %352, %353 : vector<8x32xf32>
    %355 = vector.broadcast %c4_i32 : i32 to vector<8x1xi32>
    %356 = arith.cmpi slt, %355, %0 : vector<8x1xi32>
    %357 = vector.shape_cast %356 : vector<8x1xi1> to vector<8x1xi1>
    %358 = vector.broadcast %357 : vector<8x1xi1> to vector<8x32xi1>
    %359 = arith.select %358, %354, %282 : vector<8x32xi1>, vector<8x32xf32>
    %c7_i32_128 = arith.constant 7 : i32
    %360 = arith.subi %c7_i32_128, %c4_i32 : i32
    %361 = arith.index_cast %360 : i32 to index
    %c0_129 = arith.constant 0 : index
    %c0_130 = arith.constant 0 : index
    %362 = vector.load %arg4[%361, %c0_129, %c0_130] : memref<8x8x32xf32, #tpu.memory_space<vmem>>, vector<1x8x32xf32>
    %363 = vector.shape_cast %362 : vector<1x8x32xf32> to vector<8x32xf32>
    %364 = arith.index_cast %360 : i32 to index
    %c0_131 = arith.constant 0 : index
    %c0_132 = arith.constant 0 : index
    %365 = vector.load %arg5[%364, %c0_131, %c0_132] : memref<8x8x32xf32, #tpu.memory_space<vmem>>, vector<1x8x32xf32>
    %366 = vector.shape_cast %365 : vector<1x8x32xf32> to vector<8x32xf32>
    %367 = arith.index_cast %360 : i32 to index
    %c0_133 = arith.constant 0 : index
    %c0_134 = arith.constant 0 : index
    %368 = vector.load %arg6[%367, %c0_133, %c0_134] : memref<8x8x32xf32, #tpu.memory_space<vmem>>, vector<1x8x32xf32>
    %369 = vector.shape_cast %368 : vector<1x8x32xf32> to vector<8x32xf32>
    %cst_135 = arith.constant dense<0.000000e+00> : vector<8x32xf32>
    %370 = tpu.matmul %321, %4, %cst_135 {dimension_numbers = #tpu.dot_dimension_numbers<[1], [0], [0], [1], [0, 0, 1, 1], [], []>} : vector<8x32xf32>, vector<32x32xf32>, vector<8x32xf32> -> vector<8x32xf32>
    %371 = arith.addf %363, %370 : vector<8x32xf32>
    %372 = arith.negf %371 : vector<8x32xf32>
    %373 = math.exp %372 : vector<8x32xf32>
    %cst_136 = arith.constant 1.000000e+00 : f32
    %374 = vector.broadcast %cst_136 : f32 to vector<8x32xf32>
    %375 = arith.addf %374, %373 : vector<8x32xf32>
    %376 = arith.divf %374, %375 : vector<8x32xf32>
    %cst_137 = arith.constant dense<0.000000e+00> : vector<8x32xf32>
    %377 = tpu.matmul %321, %5, %cst_137 {dimension_numbers = #tpu.dot_dimension_numbers<[1], [0], [0], [1], [0, 0, 1, 1], [], []>} : vector<8x32xf32>, vector<32x32xf32>, vector<8x32xf32> -> vector<8x32xf32>
    %378 = arith.addf %366, %377 : vector<8x32xf32>
    %379 = arith.negf %378 : vector<8x32xf32>
    %380 = math.exp %379 : vector<8x32xf32>
    %cst_138 = arith.constant 1.000000e+00 : f32
    %381 = vector.broadcast %cst_138 : f32 to vector<8x32xf32>
    %382 = arith.addf %381, %380 : vector<8x32xf32>
    %383 = arith.divf %381, %382 : vector<8x32xf32>
    %cst_139 = arith.constant dense<0.000000e+00> : vector<8x32xf32>
    %384 = tpu.matmul %321, %6, %cst_139 {dimension_numbers = #tpu.dot_dimension_numbers<[1], [0], [0], [1], [0, 0, 1, 1], [], []>} : vector<8x32xf32>, vector<32x32xf32>, vector<8x32xf32> -> vector<8x32xf32>
    %385 = arith.addf %384, %12 : vector<8x32xf32>
    %386 = arith.mulf %376, %385 : vector<8x32xf32>
    %387 = arith.addf %369, %386 : vector<8x32xf32>
    %388 = math.tanh %387 : vector<8x32xf32>
    %cst_140 = arith.constant 1.000000e+00 : f32
    %389 = vector.broadcast %cst_140 : f32 to vector<8x32xf32>
    %390 = arith.subf %389, %383 : vector<8x32xf32>
    %391 = arith.mulf %390, %388 : vector<8x32xf32>
    %392 = arith.mulf %383, %321 : vector<8x32xf32>
    %393 = arith.addf %391, %392 : vector<8x32xf32>
    %394 = vector.broadcast %360 : i32 to vector<8x1xi32>
    %395 = arith.cmpi slt, %394, %0 : vector<8x1xi32>
    %396 = vector.shape_cast %395 : vector<8x1xi1> to vector<8x1xi1>
    %397 = vector.broadcast %396 : vector<8x1xi1> to vector<8x32xi1>
    %398 = arith.select %397, %393, %321 : vector<8x32xi1>, vector<8x32xf32>
    %c5_i32 = arith.constant 5 : i32
    %399 = arith.index_cast %c5_i32 : i32 to index
    %c0_141 = arith.constant 0 : index
    %c0_142 = arith.constant 0 : index
    %400 = vector.load %arg1[%399, %c0_141, %c0_142] : memref<8x8x32xf32, #tpu.memory_space<vmem>>, vector<1x8x32xf32>
    %401 = vector.shape_cast %400 : vector<1x8x32xf32> to vector<8x32xf32>
    %402 = arith.index_cast %c5_i32 : i32 to index
    %c0_143 = arith.constant 0 : index
    %c0_144 = arith.constant 0 : index
    %403 = vector.load %arg2[%402, %c0_143, %c0_144] : memref<8x8x32xf32, #tpu.memory_space<vmem>>, vector<1x8x32xf32>
    %404 = vector.shape_cast %403 : vector<1x8x32xf32> to vector<8x32xf32>
    %405 = arith.index_cast %c5_i32 : i32 to index
    %c0_145 = arith.constant 0 : index
    %c0_146 = arith.constant 0 : index
    %406 = vector.load %arg3[%405, %c0_145, %c0_146] : memref<8x8x32xf32, #tpu.memory_space<vmem>>, vector<1x8x32xf32>
    %407 = vector.shape_cast %406 : vector<1x8x32xf32> to vector<8x32xf32>
    %cst_147 = arith.constant dense<0.000000e+00> : vector<8x32xf32>
    %408 = tpu.matmul %359, %1, %cst_147 {dimension_numbers = #tpu.dot_dimension_numbers<[1], [0], [0], [1], [0, 0, 1, 1], [], []>} : vector<8x32xf32>, vector<32x32xf32>, vector<8x32xf32> -> vector<8x32xf32>
    %409 = arith.addf %401, %408 : vector<8x32xf32>
    %410 = arith.negf %409 : vector<8x32xf32>
    %411 = math.exp %410 : vector<8x32xf32>
    %cst_148 = arith.constant 1.000000e+00 : f32
    %412 = vector.broadcast %cst_148 : f32 to vector<8x32xf32>
    %413 = arith.addf %412, %411 : vector<8x32xf32>
    %414 = arith.divf %412, %413 : vector<8x32xf32>
    %cst_149 = arith.constant dense<0.000000e+00> : vector<8x32xf32>
    %415 = tpu.matmul %359, %2, %cst_149 {dimension_numbers = #tpu.dot_dimension_numbers<[1], [0], [0], [1], [0, 0, 1, 1], [], []>} : vector<8x32xf32>, vector<32x32xf32>, vector<8x32xf32> -> vector<8x32xf32>
    %416 = arith.addf %404, %415 : vector<8x32xf32>
    %417 = arith.negf %416 : vector<8x32xf32>
    %418 = math.exp %417 : vector<8x32xf32>
    %cst_150 = arith.constant 1.000000e+00 : f32
    %419 = vector.broadcast %cst_150 : f32 to vector<8x32xf32>
    %420 = arith.addf %419, %418 : vector<8x32xf32>
    %421 = arith.divf %419, %420 : vector<8x32xf32>
    %cst_151 = arith.constant dense<0.000000e+00> : vector<8x32xf32>
    %422 = tpu.matmul %359, %3, %cst_151 {dimension_numbers = #tpu.dot_dimension_numbers<[1], [0], [0], [1], [0, 0, 1, 1], [], []>} : vector<8x32xf32>, vector<32x32xf32>, vector<8x32xf32> -> vector<8x32xf32>
    %423 = arith.addf %422, %9 : vector<8x32xf32>
    %424 = arith.mulf %414, %423 : vector<8x32xf32>
    %425 = arith.addf %407, %424 : vector<8x32xf32>
    %426 = math.tanh %425 : vector<8x32xf32>
    %cst_152 = arith.constant 1.000000e+00 : f32
    %427 = vector.broadcast %cst_152 : f32 to vector<8x32xf32>
    %428 = arith.subf %427, %421 : vector<8x32xf32>
    %429 = arith.mulf %428, %426 : vector<8x32xf32>
    %430 = arith.mulf %421, %359 : vector<8x32xf32>
    %431 = arith.addf %429, %430 : vector<8x32xf32>
    %432 = vector.broadcast %c5_i32 : i32 to vector<8x1xi32>
    %433 = arith.cmpi slt, %432, %0 : vector<8x1xi32>
    %434 = vector.shape_cast %433 : vector<8x1xi1> to vector<8x1xi1>
    %435 = vector.broadcast %434 : vector<8x1xi1> to vector<8x32xi1>
    %436 = arith.select %435, %431, %359 : vector<8x32xi1>, vector<8x32xf32>
    %c7_i32_153 = arith.constant 7 : i32
    %437 = arith.subi %c7_i32_153, %c5_i32 : i32
    %438 = arith.index_cast %437 : i32 to index
    %c0_154 = arith.constant 0 : index
    %c0_155 = arith.constant 0 : index
    %439 = vector.load %arg4[%438, %c0_154, %c0_155] : memref<8x8x32xf32, #tpu.memory_space<vmem>>, vector<1x8x32xf32>
    %440 = vector.shape_cast %439 : vector<1x8x32xf32> to vector<8x32xf32>
    %441 = arith.index_cast %437 : i32 to index
    %c0_156 = arith.constant 0 : index
    %c0_157 = arith.constant 0 : index
    %442 = vector.load %arg5[%441, %c0_156, %c0_157] : memref<8x8x32xf32, #tpu.memory_space<vmem>>, vector<1x8x32xf32>
    %443 = vector.shape_cast %442 : vector<1x8x32xf32> to vector<8x32xf32>
    %444 = arith.index_cast %437 : i32 to index
    %c0_158 = arith.constant 0 : index
    %c0_159 = arith.constant 0 : index
    %445 = vector.load %arg6[%444, %c0_158, %c0_159] : memref<8x8x32xf32, #tpu.memory_space<vmem>>, vector<1x8x32xf32>
    %446 = vector.shape_cast %445 : vector<1x8x32xf32> to vector<8x32xf32>
    %cst_160 = arith.constant dense<0.000000e+00> : vector<8x32xf32>
    %447 = tpu.matmul %398, %4, %cst_160 {dimension_numbers = #tpu.dot_dimension_numbers<[1], [0], [0], [1], [0, 0, 1, 1], [], []>} : vector<8x32xf32>, vector<32x32xf32>, vector<8x32xf32> -> vector<8x32xf32>
    %448 = arith.addf %440, %447 : vector<8x32xf32>
    %449 = arith.negf %448 : vector<8x32xf32>
    %450 = math.exp %449 : vector<8x32xf32>
    %cst_161 = arith.constant 1.000000e+00 : f32
    %451 = vector.broadcast %cst_161 : f32 to vector<8x32xf32>
    %452 = arith.addf %451, %450 : vector<8x32xf32>
    %453 = arith.divf %451, %452 : vector<8x32xf32>
    %cst_162 = arith.constant dense<0.000000e+00> : vector<8x32xf32>
    %454 = tpu.matmul %398, %5, %cst_162 {dimension_numbers = #tpu.dot_dimension_numbers<[1], [0], [0], [1], [0, 0, 1, 1], [], []>} : vector<8x32xf32>, vector<32x32xf32>, vector<8x32xf32> -> vector<8x32xf32>
    %455 = arith.addf %443, %454 : vector<8x32xf32>
    %456 = arith.negf %455 : vector<8x32xf32>
    %457 = math.exp %456 : vector<8x32xf32>
    %cst_163 = arith.constant 1.000000e+00 : f32
    %458 = vector.broadcast %cst_163 : f32 to vector<8x32xf32>
    %459 = arith.addf %458, %457 : vector<8x32xf32>
    %460 = arith.divf %458, %459 : vector<8x32xf32>
    %cst_164 = arith.constant dense<0.000000e+00> : vector<8x32xf32>
    %461 = tpu.matmul %398, %6, %cst_164 {dimension_numbers = #tpu.dot_dimension_numbers<[1], [0], [0], [1], [0, 0, 1, 1], [], []>} : vector<8x32xf32>, vector<32x32xf32>, vector<8x32xf32> -> vector<8x32xf32>
    %462 = arith.addf %461, %12 : vector<8x32xf32>
    %463 = arith.mulf %453, %462 : vector<8x32xf32>
    %464 = arith.addf %446, %463 : vector<8x32xf32>
    %465 = math.tanh %464 : vector<8x32xf32>
    %cst_165 = arith.constant 1.000000e+00 : f32
    %466 = vector.broadcast %cst_165 : f32 to vector<8x32xf32>
    %467 = arith.subf %466, %460 : vector<8x32xf32>
    %468 = arith.mulf %467, %465 : vector<8x32xf32>
    %469 = arith.mulf %460, %398 : vector<8x32xf32>
    %470 = arith.addf %468, %469 : vector<8x32xf32>
    %471 = vector.broadcast %437 : i32 to vector<8x1xi32>
    %472 = arith.cmpi slt, %471, %0 : vector<8x1xi32>
    %473 = vector.shape_cast %472 : vector<8x1xi1> to vector<8x1xi1>
    %474 = vector.broadcast %473 : vector<8x1xi1> to vector<8x32xi1>
    %475 = arith.select %474, %470, %398 : vector<8x32xi1>, vector<8x32xf32>
    %c6_i32 = arith.constant 6 : i32
    %476 = arith.index_cast %c6_i32 : i32 to index
    %c0_166 = arith.constant 0 : index
    %c0_167 = arith.constant 0 : index
    %477 = vector.load %arg1[%476, %c0_166, %c0_167] : memref<8x8x32xf32, #tpu.memory_space<vmem>>, vector<1x8x32xf32>
    %478 = vector.shape_cast %477 : vector<1x8x32xf32> to vector<8x32xf32>
    %479 = arith.index_cast %c6_i32 : i32 to index
    %c0_168 = arith.constant 0 : index
    %c0_169 = arith.constant 0 : index
    %480 = vector.load %arg2[%479, %c0_168, %c0_169] : memref<8x8x32xf32, #tpu.memory_space<vmem>>, vector<1x8x32xf32>
    %481 = vector.shape_cast %480 : vector<1x8x32xf32> to vector<8x32xf32>
    %482 = arith.index_cast %c6_i32 : i32 to index
    %c0_170 = arith.constant 0 : index
    %c0_171 = arith.constant 0 : index
    %483 = vector.load %arg3[%482, %c0_170, %c0_171] : memref<8x8x32xf32, #tpu.memory_space<vmem>>, vector<1x8x32xf32>
    %484 = vector.shape_cast %483 : vector<1x8x32xf32> to vector<8x32xf32>
    %cst_172 = arith.constant dense<0.000000e+00> : vector<8x32xf32>
    %485 = tpu.matmul %436, %1, %cst_172 {dimension_numbers = #tpu.dot_dimension_numbers<[1], [0], [0], [1], [0, 0, 1, 1], [], []>} : vector<8x32xf32>, vector<32x32xf32>, vector<8x32xf32> -> vector<8x32xf32>
    %486 = arith.addf %478, %485 : vector<8x32xf32>
    %487 = arith.negf %486 : vector<8x32xf32>
    %488 = math.exp %487 : vector<8x32xf32>
    %cst_173 = arith.constant 1.000000e+00 : f32
    %489 = vector.broadcast %cst_173 : f32 to vector<8x32xf32>
    %490 = arith.addf %489, %488 : vector<8x32xf32>
    %491 = arith.divf %489, %490 : vector<8x32xf32>
    %cst_174 = arith.constant dense<0.000000e+00> : vector<8x32xf32>
    %492 = tpu.matmul %436, %2, %cst_174 {dimension_numbers = #tpu.dot_dimension_numbers<[1], [0], [0], [1], [0, 0, 1, 1], [], []>} : vector<8x32xf32>, vector<32x32xf32>, vector<8x32xf32> -> vector<8x32xf32>
    %493 = arith.addf %481, %492 : vector<8x32xf32>
    %494 = arith.negf %493 : vector<8x32xf32>
    %495 = math.exp %494 : vector<8x32xf32>
    %cst_175 = arith.constant 1.000000e+00 : f32
    %496 = vector.broadcast %cst_175 : f32 to vector<8x32xf32>
    %497 = arith.addf %496, %495 : vector<8x32xf32>
    %498 = arith.divf %496, %497 : vector<8x32xf32>
    %cst_176 = arith.constant dense<0.000000e+00> : vector<8x32xf32>
    %499 = tpu.matmul %436, %3, %cst_176 {dimension_numbers = #tpu.dot_dimension_numbers<[1], [0], [0], [1], [0, 0, 1, 1], [], []>} : vector<8x32xf32>, vector<32x32xf32>, vector<8x32xf32> -> vector<8x32xf32>
    %500 = arith.addf %499, %9 : vector<8x32xf32>
    %501 = arith.mulf %491, %500 : vector<8x32xf32>
    %502 = arith.addf %484, %501 : vector<8x32xf32>
    %503 = math.tanh %502 : vector<8x32xf32>
    %cst_177 = arith.constant 1.000000e+00 : f32
    %504 = vector.broadcast %cst_177 : f32 to vector<8x32xf32>
    %505 = arith.subf %504, %498 : vector<8x32xf32>
    %506 = arith.mulf %505, %503 : vector<8x32xf32>
    %507 = arith.mulf %498, %436 : vector<8x32xf32>
    %508 = arith.addf %506, %507 : vector<8x32xf32>
    %509 = vector.broadcast %c6_i32 : i32 to vector<8x1xi32>
    %510 = arith.cmpi slt, %509, %0 : vector<8x1xi32>
    %511 = vector.shape_cast %510 : vector<8x1xi1> to vector<8x1xi1>
    %512 = vector.broadcast %511 : vector<8x1xi1> to vector<8x32xi1>
    %513 = arith.select %512, %508, %436 : vector<8x32xi1>, vector<8x32xf32>
    %c7_i32_178 = arith.constant 7 : i32
    %514 = arith.subi %c7_i32_178, %c6_i32 : i32
    %515 = arith.index_cast %514 : i32 to index
    %c0_179 = arith.constant 0 : index
    %c0_180 = arith.constant 0 : index
    %516 = vector.load %arg4[%515, %c0_179, %c0_180] : memref<8x8x32xf32, #tpu.memory_space<vmem>>, vector<1x8x32xf32>
    %517 = vector.shape_cast %516 : vector<1x8x32xf32> to vector<8x32xf32>
    %518 = arith.index_cast %514 : i32 to index
    %c0_181 = arith.constant 0 : index
    %c0_182 = arith.constant 0 : index
    %519 = vector.load %arg5[%518, %c0_181, %c0_182] : memref<8x8x32xf32, #tpu.memory_space<vmem>>, vector<1x8x32xf32>
    %520 = vector.shape_cast %519 : vector<1x8x32xf32> to vector<8x32xf32>
    %521 = arith.index_cast %514 : i32 to index
    %c0_183 = arith.constant 0 : index
    %c0_184 = arith.constant 0 : index
    %522 = vector.load %arg6[%521, %c0_183, %c0_184] : memref<8x8x32xf32, #tpu.memory_space<vmem>>, vector<1x8x32xf32>
    %523 = vector.shape_cast %522 : vector<1x8x32xf32> to vector<8x32xf32>
    %cst_185 = arith.constant dense<0.000000e+00> : vector<8x32xf32>
    %524 = tpu.matmul %475, %4, %cst_185 {dimension_numbers = #tpu.dot_dimension_numbers<[1], [0], [0], [1], [0, 0, 1, 1], [], []>} : vector<8x32xf32>, vector<32x32xf32>, vector<8x32xf32> -> vector<8x32xf32>
    %525 = arith.addf %517, %524 : vector<8x32xf32>
    %526 = arith.negf %525 : vector<8x32xf32>
    %527 = math.exp %526 : vector<8x32xf32>
    %cst_186 = arith.constant 1.000000e+00 : f32
    %528 = vector.broadcast %cst_186 : f32 to vector<8x32xf32>
    %529 = arith.addf %528, %527 : vector<8x32xf32>
    %530 = arith.divf %528, %529 : vector<8x32xf32>
    %cst_187 = arith.constant dense<0.000000e+00> : vector<8x32xf32>
    %531 = tpu.matmul %475, %5, %cst_187 {dimension_numbers = #tpu.dot_dimension_numbers<[1], [0], [0], [1], [0, 0, 1, 1], [], []>} : vector<8x32xf32>, vector<32x32xf32>, vector<8x32xf32> -> vector<8x32xf32>
    %532 = arith.addf %520, %531 : vector<8x32xf32>
    %533 = arith.negf %532 : vector<8x32xf32>
    %534 = math.exp %533 : vector<8x32xf32>
    %cst_188 = arith.constant 1.000000e+00 : f32
    %535 = vector.broadcast %cst_188 : f32 to vector<8x32xf32>
    %536 = arith.addf %535, %534 : vector<8x32xf32>
    %537 = arith.divf %535, %536 : vector<8x32xf32>
    %cst_189 = arith.constant dense<0.000000e+00> : vector<8x32xf32>
    %538 = tpu.matmul %475, %6, %cst_189 {dimension_numbers = #tpu.dot_dimension_numbers<[1], [0], [0], [1], [0, 0, 1, 1], [], []>} : vector<8x32xf32>, vector<32x32xf32>, vector<8x32xf32> -> vector<8x32xf32>
    %539 = arith.addf %538, %12 : vector<8x32xf32>
    %540 = arith.mulf %530, %539 : vector<8x32xf32>
    %541 = arith.addf %523, %540 : vector<8x32xf32>
    %542 = math.tanh %541 : vector<8x32xf32>
    %cst_190 = arith.constant 1.000000e+00 : f32
    %543 = vector.broadcast %cst_190 : f32 to vector<8x32xf32>
    %544 = arith.subf %543, %537 : vector<8x32xf32>
    %545 = arith.mulf %544, %542 : vector<8x32xf32>
    %546 = arith.mulf %537, %475 : vector<8x32xf32>
    %547 = arith.addf %545, %546 : vector<8x32xf32>
    %548 = vector.broadcast %514 : i32 to vector<8x1xi32>
    %549 = arith.cmpi slt, %548, %0 : vector<8x1xi32>
    %550 = vector.shape_cast %549 : vector<8x1xi1> to vector<8x1xi1>
    %551 = vector.broadcast %550 : vector<8x1xi1> to vector<8x32xi1>
    %552 = arith.select %551, %547, %475 : vector<8x32xi1>, vector<8x32xf32>
    %c7_i32_191 = arith.constant 7 : i32
    %553 = arith.index_cast %c7_i32_191 : i32 to index
    %c0_192 = arith.constant 0 : index
    %c0_193 = arith.constant 0 : index
    %554 = vector.load %arg1[%553, %c0_192, %c0_193] : memref<8x8x32xf32, #tpu.memory_space<vmem>>, vector<1x8x32xf32>
    %555 = vector.shape_cast %554 : vector<1x8x32xf32> to vector<8x32xf32>
    %556 = arith.index_cast %c7_i32_191 : i32 to index
    %c0_194 = arith.constant 0 : index
    %c0_195 = arith.constant 0 : index
    %557 = vector.load %arg2[%556, %c0_194, %c0_195] : memref<8x8x32xf32, #tpu.memory_space<vmem>>, vector<1x8x32xf32>
    %558 = vector.shape_cast %557 : vector<1x8x32xf32> to vector<8x32xf32>
    %559 = arith.index_cast %c7_i32_191 : i32 to index
    %c0_196 = arith.constant 0 : index
    %c0_197 = arith.constant 0 : index
    %560 = vector.load %arg3[%559, %c0_196, %c0_197] : memref<8x8x32xf32, #tpu.memory_space<vmem>>, vector<1x8x32xf32>
    %561 = vector.shape_cast %560 : vector<1x8x32xf32> to vector<8x32xf32>
    %cst_198 = arith.constant dense<0.000000e+00> : vector<8x32xf32>
    %562 = tpu.matmul %513, %1, %cst_198 {dimension_numbers = #tpu.dot_dimension_numbers<[1], [0], [0], [1], [0, 0, 1, 1], [], []>} : vector<8x32xf32>, vector<32x32xf32>, vector<8x32xf32> -> vector<8x32xf32>
    %563 = arith.addf %555, %562 : vector<8x32xf32>
    %564 = arith.negf %563 : vector<8x32xf32>
    %565 = math.exp %564 : vector<8x32xf32>
    %cst_199 = arith.constant 1.000000e+00 : f32
    %566 = vector.broadcast %cst_199 : f32 to vector<8x32xf32>
    %567 = arith.addf %566, %565 : vector<8x32xf32>
    %568 = arith.divf %566, %567 : vector<8x32xf32>
    %cst_200 = arith.constant dense<0.000000e+00> : vector<8x32xf32>
    %569 = tpu.matmul %513, %2, %cst_200 {dimension_numbers = #tpu.dot_dimension_numbers<[1], [0], [0], [1], [0, 0, 1, 1], [], []>} : vector<8x32xf32>, vector<32x32xf32>, vector<8x32xf32> -> vector<8x32xf32>
    %570 = arith.addf %558, %569 : vector<8x32xf32>
    %571 = arith.negf %570 : vector<8x32xf32>
    %572 = math.exp %571 : vector<8x32xf32>
    %cst_201 = arith.constant 1.000000e+00 : f32
    %573 = vector.broadcast %cst_201 : f32 to vector<8x32xf32>
    %574 = arith.addf %573, %572 : vector<8x32xf32>
    %575 = arith.divf %573, %574 : vector<8x32xf32>
    %cst_202 = arith.constant dense<0.000000e+00> : vector<8x32xf32>
    %576 = tpu.matmul %513, %3, %cst_202 {dimension_numbers = #tpu.dot_dimension_numbers<[1], [0], [0], [1], [0, 0, 1, 1], [], []>} : vector<8x32xf32>, vector<32x32xf32>, vector<8x32xf32> -> vector<8x32xf32>
    %577 = arith.addf %576, %9 : vector<8x32xf32>
    %578 = arith.mulf %568, %577 : vector<8x32xf32>
    %579 = arith.addf %561, %578 : vector<8x32xf32>
    %580 = math.tanh %579 : vector<8x32xf32>
    %cst_203 = arith.constant 1.000000e+00 : f32
    %581 = vector.broadcast %cst_203 : f32 to vector<8x32xf32>
    %582 = arith.subf %581, %575 : vector<8x32xf32>
    %583 = arith.mulf %582, %580 : vector<8x32xf32>
    %584 = arith.mulf %575, %513 : vector<8x32xf32>
    %585 = arith.addf %583, %584 : vector<8x32xf32>
    %586 = vector.broadcast %c7_i32_191 : i32 to vector<8x1xi32>
    %587 = arith.cmpi slt, %586, %0 : vector<8x1xi32>
    %588 = vector.shape_cast %587 : vector<8x1xi1> to vector<8x1xi1>
    %589 = vector.broadcast %588 : vector<8x1xi1> to vector<8x32xi1>
    %590 = arith.select %589, %585, %513 : vector<8x32xi1>, vector<8x32xf32>
    %c7_i32_204 = arith.constant 7 : i32
    %591 = arith.subi %c7_i32_204, %c7_i32_191 : i32
    %592 = arith.index_cast %591 : i32 to index
    %c0_205 = arith.constant 0 : index
    %c0_206 = arith.constant 0 : index
    %593 = vector.load %arg4[%592, %c0_205, %c0_206] : memref<8x8x32xf32, #tpu.memory_space<vmem>>, vector<1x8x32xf32>
    %594 = vector.shape_cast %593 : vector<1x8x32xf32> to vector<8x32xf32>
    %595 = arith.index_cast %591 : i32 to index
    %c0_207 = arith.constant 0 : index
    %c0_208 = arith.constant 0 : index
    %596 = vector.load %arg5[%595, %c0_207, %c0_208] : memref<8x8x32xf32, #tpu.memory_space<vmem>>, vector<1x8x32xf32>
    %597 = vector.shape_cast %596 : vector<1x8x32xf32> to vector<8x32xf32>
    %598 = arith.index_cast %591 : i32 to index
    %c0_209 = arith.constant 0 : index
    %c0_210 = arith.constant 0 : index
    %599 = vector.load %arg6[%598, %c0_209, %c0_210] : memref<8x8x32xf32, #tpu.memory_space<vmem>>, vector<1x8x32xf32>
    %600 = vector.shape_cast %599 : vector<1x8x32xf32> to vector<8x32xf32>
    %cst_211 = arith.constant dense<0.000000e+00> : vector<8x32xf32>
    %601 = tpu.matmul %552, %4, %cst_211 {dimension_numbers = #tpu.dot_dimension_numbers<[1], [0], [0], [1], [0, 0, 1, 1], [], []>} : vector<8x32xf32>, vector<32x32xf32>, vector<8x32xf32> -> vector<8x32xf32>
    %602 = arith.addf %594, %601 : vector<8x32xf32>
    %603 = arith.negf %602 : vector<8x32xf32>
    %604 = math.exp %603 : vector<8x32xf32>
    %cst_212 = arith.constant 1.000000e+00 : f32
    %605 = vector.broadcast %cst_212 : f32 to vector<8x32xf32>
    %606 = arith.addf %605, %604 : vector<8x32xf32>
    %607 = arith.divf %605, %606 : vector<8x32xf32>
    %cst_213 = arith.constant dense<0.000000e+00> : vector<8x32xf32>
    %608 = tpu.matmul %552, %5, %cst_213 {dimension_numbers = #tpu.dot_dimension_numbers<[1], [0], [0], [1], [0, 0, 1, 1], [], []>} : vector<8x32xf32>, vector<32x32xf32>, vector<8x32xf32> -> vector<8x32xf32>
    %609 = arith.addf %597, %608 : vector<8x32xf32>
    %610 = arith.negf %609 : vector<8x32xf32>
    %611 = math.exp %610 : vector<8x32xf32>
    %cst_214 = arith.constant 1.000000e+00 : f32
    %612 = vector.broadcast %cst_214 : f32 to vector<8x32xf32>
    %613 = arith.addf %612, %611 : vector<8x32xf32>
    %614 = arith.divf %612, %613 : vector<8x32xf32>
    %cst_215 = arith.constant dense<0.000000e+00> : vector<8x32xf32>
    %615 = tpu.matmul %552, %6, %cst_215 {dimension_numbers = #tpu.dot_dimension_numbers<[1], [0], [0], [1], [0, 0, 1, 1], [], []>} : vector<8x32xf32>, vector<32x32xf32>, vector<8x32xf32> -> vector<8x32xf32>
    %616 = arith.addf %615, %12 : vector<8x32xf32>
    %617 = arith.mulf %607, %616 : vector<8x32xf32>
    %618 = arith.addf %600, %617 : vector<8x32xf32>
    %619 = math.tanh %618 : vector<8x32xf32>
    %cst_216 = arith.constant 1.000000e+00 : f32
    %620 = vector.broadcast %cst_216 : f32 to vector<8x32xf32>
    %621 = arith.subf %620, %614 : vector<8x32xf32>
    %622 = arith.mulf %621, %619 : vector<8x32xf32>
    %623 = arith.mulf %614, %552 : vector<8x32xf32>
    %624 = arith.addf %622, %623 : vector<8x32xf32>
    %625 = vector.broadcast %591 : i32 to vector<8x1xi32>
    %626 = arith.cmpi slt, %625, %0 : vector<8x1xi32>
    %627 = vector.shape_cast %626 : vector<8x1xi1> to vector<8x1xi1>
    %628 = vector.broadcast %627 : vector<8x1xi1> to vector<8x32xi1>
    %629 = arith.select %628, %624, %552 : vector<8x32xi1>, vector<8x32xf32>
    %c8_i32 = arith.constant 8 : i32
    %c0_217 = arith.constant 0 : index
    %c0_218 = arith.constant 0 : index
    %630 = vector.load %arg15[%c0_217, %c0_218] : memref<32x128xf32, #tpu.memory_space<vmem>>, vector<32x128xf32>
    %cst_219 = arith.constant dense<0.000000e+00> : vector<8x128xf32>
    %631 = tpu.matmul %629, %630, %cst_219 {dimension_numbers = #tpu.dot_dimension_numbers<[1], [0], [0], [1], [0, 0, 1, 1], [], []>} : vector<8x32xf32>, vector<32x128xf32>, vector<8x128xf32> -> vector<8x128xf32>
    %c0_220 = arith.constant 0 : index
    %c0_221 = arith.constant 0 : index
    %632 = vector.load %arg16[%c0_220, %c0_221] : memref<32x128xf32, #tpu.memory_space<vmem>>, vector<32x128xf32>
    %cst_222 = arith.constant dense<0.000000e+00> : vector<8x128xf32>
    %633 = tpu.matmul %590, %632, %cst_222 {dimension_numbers = #tpu.dot_dimension_numbers<[1], [0], [0], [1], [0, 0, 1, 1], [], []>} : vector<8x32xf32>, vector<32x128xf32>, vector<8x128xf32> -> vector<8x128xf32>
    %634 = arith.addf %631, %633 : vector<8x128xf32>
    %c0_223 = arith.constant 0 : index
    %c0_224 = arith.constant 0 : index
    %635 = vector.load %arg17[%c0_223, %c0_224] : memref<1x128xf32, #tpu.memory_space<vmem>>, vector<1x128xf32>
    %636 = vector.broadcast %635 : vector<1x128xf32> to vector<8x128xf32>
    %637 = arith.addf %634, %636 : vector<8x128xf32>
    %c0_225 = arith.constant 0 : index
    %c0_226 = arith.constant 0 : index
    %638 = vector.load %arg18[%c0_225, %c0_226] : memref<8x128xf32, #tpu.memory_space<vmem>>, vector<8x128xf32>
    tpu.vector_store %arg18[%c0_225, %c0_226], %637 {strides = array<i32>} : memref<8x128xf32, #tpu.memory_space<vmem>>, vector<8x128xf32>,
    return
  }
}

</mosaic_0001>

<bundles_post_ra>
// kernel: rnn_classification_forward.1
= control target key start
LH: loop header
LB: loop body
LE: loop exit
PB: predicated region body
PF: predicated region fallthrough
CT: control target
= control target key end

     0   :  { %v5550_v0 = vmov 0.0|0.0   ;;  %vm5551_vm0 = vmmov 0   ;;  %v5552_v8 = vmov 0.0   ;;  %v5553_v12 = vmov 0   ;;  %s6478_s7 = inlined_call_operand.vmem [shape: f32[32,32], index: 7, kind: input, shape index: {}]   ;;  %s6479_s8 = inlined_call_operand.vmem [shape: f32[32,32], index: 8, kind: input, shape index: {}]   ;;  %s6480_s9 = inlined_call_operand.vmem [shape: f32[32,32], index: 9, kind: input, shape index: {}]   ;;  %s6481_s11 = inlined_call_operand.vmem [shape: f32[32,32], index: 11, kind: input, shape index: {}]   ;;  %s6482_s0 = inlined_call_operand.vmem [shape: s32[8,1], index: 0, kind: input, shape index: {}]   ;;  %s6483_s12 = inlined_call_operand.vmem [shape: f32[32,32], index: 12, kind: input, shape index: {}]   ;;  %s6484_s13 = inlined_call_operand.vmem [shape: f32[32,32], index: 13, kind: input, shape index: {}]   ;;  %s6485_s1 = inlined_call_operand.vmem [shape: f32[8,8,32], index: 1, kind: input, shape index: {}]   ;;  %s6486_s2 = inlined_call_operand.vmem [shape: f32[8,8,32], index: 2, kind: input, shape index: {}]   ;;  %s6487_s4 = inlined_call_operand.vmem [shape: f32[8,8,32], index: 4, kind: input, shape index: {}]   ;;  %s6488_s5 = inlined_call_operand.vmem [shape: f32[8,8,32], index: 5, kind: input, shape index: {}]   ;;  %s6489_s10 = inlined_call_operand.vmem [shape: f32[1,32], index: 10, kind: input, shape index: {}]   ;;  %s6490_s3 = inlined_call_operand.vmem [shape: f32[8,8,32], index: 3, kind: input, shape index: {}]   ;;  %s6491_s14 = inlined_call_operand.vmem [shape: f32[1,32], index: 14, kind: input, shape index: {}]   ;;  %s6492_s6 = inlined_call_operand.vmem [shape: f32[8,8,32], index: 6, kind: input, shape index: {}]   ;;  %s6493_s16 = inlined_call_operand.vmem [shape: f32[32,128], index: 16, kind: input, shape index: {}]   ;;  %s6494_s15 = inlined_call_operand.vmem [shape: f32[32,128], index: 15, kind: input, shape index: {}]   ;;  %s6495_s17 = inlined_call_operand.vmem [shape: f32[1,128], index: 17, kind: input, shape index: {}]   ;;  %s6496_s18 = inlined_call_operand.vmem [shape: f32[8,128], index: 18, kind: output, shape index: {}]  }
   0x1   :  { %6500 = sst [smem:[#allocation2_spill]] %s6478_s7  ;;  %5082 = vmatprep.subr.bf16.mxu0 %v5550_v0  ;;  %5088 = vmatprep.subr.bf16.mxu1 %v5550_v0  ;;  %v72_v17 = vld [vmem:[%s6481_s11] sm:$0xff]  ;;  %v73_v18 = vld [vmem:[%s6481_s11 + $0x8] sm:$0xff]  ;;  %v74_v24 = vld [vmem:[%s6481_s11 + $0x10] sm:$0xff]  ;;  %vm101_vm10 = vcmask 261120  }
   0x2   :  { %6501 = sst [smem:[#allocation3_spill]] %s6479_s8  ;;  %s6503_s29 = sld [smem:[#allocation2_spill]]  ;;  %4540 = vmatprep.mubr.msk.f32.mxu0 %vm5551_vm0, %v5552_v8  ;;  %4551 = vmatprep.mubr.msk.f32.mxu1 %vm5551_vm0, %v5552_v8  ;;  %v5709_v20 = vpack.c.bf16 %v73_v18, %v72_v17  ;;  %v5721_v23 = vld [vmem:[%s6482_s0] sm:$0xff]  ;;  %v75_v25 = vld [vmem:[%s6481_s11 + $0x18] sm:$0xff]  ;;  %v77_v30 = vld [vmem:[%s6483_s12 + $0x8] sm:$0xff] }
   0x3   :  { %6502 = sst [smem:[#allocation4_spill]] %s6480_s9  ;;  %s6504_s20 = sld [smem:[#allocation3_spill]]  ;;  %5386 = vset.pattern.permute.xlu0 %v5553_v12  ;;  %5387 = vset.pattern.permute.xlu1 %v5553_v12  ;;  %vm336_vm1 = vcmp.gt.s32.totalorder %v5721_v23, 0  ;;  %v5738_v28 = vpack.c.bf16 %v75_v25, %v74_v24  ;;  %v76_v29 = vld [vmem:[%s6483_s12] sm:$0xff]  ;;  %vm580_vm2 = vcmp.gt.s32.totalorder %v5721_v23, 7  ;;  %v81_v32 = vld [vmem:[%s6484_s13 + $0x8] sm:$0xff] }
   0x4   :  { %s6505_s19 = sld [smem:[#allocation4_spill]]  ;;  %v337_v27 = vsel %vm336_vm1, 1, %v5553_v12  ;;  %v80_v31 = vld [vmem:[%s6484_s13] sm:$0xff]  ;;  %v5760_v33 = vpack.c.bf16 %v77_v30, %v76_v29  ;;  %v581_v34 = vsel %vm580_vm2, 1, %v5553_v12  ;;  %v78_v35 = vld [vmem:[%s6483_s12 + $0x10] sm:$0xff]  ;;  %v79_v36 = vld [vmem:[%s6483_s12 + $0x18] sm:$0xff] }
   0x5   :  { %339 = vperm.xlu0 %5386, %v337_v27   ;;  %vm1321_vm3 = vcmp.gt.s32.totalorder %v5721_v23, 2  ;;  %v5773_v37 = vpack.c.bf16 %v81_v32, %v80_v31  ;;  %v82_v38 = vld [vmem:[%s6484_s13 + $0x10] sm:$0xff]  ;;  %v83_v39 = vld [vmem:[%s6484_s13 + $0x18] sm:$0xff]  ;;  %v5784_v40 = vpack.c.bf16 %v79_v36, %v78_v35  ;;  %vm1815_vm4 = vcmp.gt.s32.totalorder %v5721_v23, 3  ;;  %v98_v48 = vld [vmem:[%s6485_s1] sm:$0xff] }
   0x6   :  { %v1322_v41 = vsel %vm1321_vm3, 1, %v5553_v12  ;;  %v5792_v42 = vpack.c.bf16 %v83_v39, %v82_v38  ;;  %v1816_v43 = vsel %vm1815_vm4, 1, %v5553_v12  ;;  %vm827_vm5 = vcmp.gt.s32.totalorder %v5721_v23, 1  ;;  %v99_v51 = vld [vmem:[%s6486_s2] sm:$0xff]  ;;  %v4165_v57 = vld [vmem:[%s6487_s4 + $0x38] sm:$0xff] }
   0x7   :  { %vm1074_vm6 = vcmp.gt.s32.totalorder %v5721_v23, 6  ;;  %v828_v44 = vsel %vm827_vm5, 1, %v5553_v12  ;;  %vm1568_vm7 = vcmp.gt.s32.totalorder %v5721_v23, 5  ;;  %vm2062_vm8 = vcmp.gt.s32.totalorder %v5721_v23, 4  ;;  %v5839_v18 = vld [vmem:[%s6489_s10] ss:$0 sm:$0xff] }
   0x8   :  { %v60_v1 = vld [vmem:[%s6503_s29] sm:$0xff]  ;;  %v61_v2 = vld [vmem:[%s6503_s29 + $0x8] sm:$0xff]  ;;  %v62_v6 = vld [vmem:[%s6503_s29 + $0x10] sm:$0xff]  ;;  %830 = vperm.xlu1 %5387, %v828_v44   ;;  %v1075_v45 = vsel %vm1074_vm6, 1, %v5553_v12  ;;  %v1569_v46 = vsel %vm1568_vm7, 1, %v5553_v12  ;;  %v2063_v47 = vsel %vm2062_vm8, 1, %v5553_v12 }
   0x9   :  { %v64_v3 = vld [vmem:[%s6504_s20] sm:$0xff]  ;;  %v5660_v4 = vpack.c.bf16 %v61_v2, %v60_v1  ;;  %v65_v5 = vld [vmem:[%s6504_s20 + $0x8] sm:$0xff]  ;;  %v63_v7 = vld [vmem:[%s6503_s29 + $0x18] sm:$0xff]  ;;  %583 = vperm.xlu0 %5386, %v581_v34  }
   0xa   :  { %v5675_v9 = vpack.c.bf16 %v65_v5, %v64_v3  ;;  %v66_v10 = vld [vmem:[%s6504_s20 + $0x10] sm:$0xff]  ;;  %v67_v11 = vld [vmem:[%s6504_s20 + $0x18] sm:$0xff]  ;;  %v5686_v13 = vpack.c.bf16 %v63_v7, %v62_v6  ;;  %v68_v15 = vld [vmem:[%s6505_s19] sm:$0xff] }
   0xb   :  { %5084 = vmatpush3.bf16.msra.mxu0 %v5660_v4  ;;  %v5690_v14 = vpack.c.bf16 %v67_v11, %v66_v10  ;;  %v69_v16 = vld [vmem:[%s6505_s19 + $0x8] sm:$0xff]  ;;  %v70_v21 = vld [vmem:[%s6505_s19 + $0x10] sm:$0xff]  ;;  %v71_v22 = vld [vmem:[%s6505_s19 + $0x18] sm:$0xff] }
   0xc   :  { %5090 = vmatpush3.bf16.msra.mxu1 %v5675_v9  ;;  %5085 = vmatprep.subr.bf16.mxu0 %v5550_v0  ;;  %v5706_v19 = vpack.c.bf16 %v69_v16, %v68_v15  ;;  %v5734_v26 = vpack.c.bf16 %v71_v22, %v70_v21  ;;  %v4166_v2 = vld [vmem:[%s6488_s5 + $0x38] sm:$0xff]  ;;  %v100_v25 = vld [vmem:[%s6490_s3] sm:$0xff] }
   0xd   :  { %5091 = vmatprep.subr.bf16.mxu1 %v5550_v0  ;;  %1324 = vperm.xlu0 %5386, %v1322_v41   ;;  %v5848_v31 = vld [vmem:[%s6491_s14] ss:$0 sm:$0xff]  ;;  %v4167_v36 = vld [vmem:[%s6492_s6 + $0x38] sm:$0xff] }
   0xe   :  { %1077 = vperm.xlu1 %5387, %v1075_v45  }
   0xf   :  { %5087 = vmatpush3.bf16.msra.mxu0 %v5686_v13 }
  0x10   :  { %5093 = vmatpush3.bf16.msra.mxu1 %v5690_v14  ;;  %5094 = vmatprep.subr.bf16.mxu0 %v5550_v0 }
  0x11   :  { %5100 = vmatprep.subr.bf16.mxu1 %v5550_v0  ;;  %1818 = vperm.xlu0 %5386, %v1816_v43  }
  0x12   :  { %4541 = vmatmul.mubr.f32.vlgmr.msra.gmra.mrb[0].mxu0 %v5552_v8  ;;  %1571 = vperm.xlu1 %5387, %v1569_v46  }
  0x13   :  { %4552 = vmatmul.mubr.f32.vlgmr.msra.gmra.mrb[0].mxu1 %v5552_v8  ;;  %5096 = vmatpush3.bf16.msra.mxu0 %v5706_v19 }
  0x14   :  { %5102 = vmatpush3.bf16.msra.mxu1 %v5709_v20  ;;  %4573 = vmatprep.mubr.msk.f32.mxu1 %vm5551_vm0, %v5552_v8 }
  0x15   :  { %5103 = vmatprep.subr.bf16.mxu1 %v5550_v0  ;;  %5097 = vmatprep.subr.bf16.mxu0 %v5550_v0 }
  0x16   :  { %4562 = vmatprep.mubr.msk.f32.mxu0 %vm5551_vm0, %v5552_v8  ;;  %2065 = vperm.xlu1 %5387, %v2063_v47  }
  0x17   :  { %5099 = vmatpush3.bf16.msra.mxu0 %v5734_v26 }
  0x18   :  { %5105 = vmatpush3.bf16.msra.mxu1 %v5738_v28  ;;  %5106 = vmatprep.subr.bf16.mxu0 %v5550_v0 }
  0x19   :  { %5112 = vmatprep.subr.bf16.mxu1 %v5550_v0 }
  0x1a   :  { %4563 = vmatmul.mubr.f32.vlgmr.msra.gmra.mrb[2].mxu0 %v5552_v8 }
  0x1b   :  { %4574 = vmatmul.mubr.f32.vlgmr.msra.gmra.mrb[2].mxu1 %v5552_v8  ;;  %5108 = vmatpush3.bf16.msra.mxu0 %v5760_v33 }
  0x1c   :  { %5109 = vmatprep.subr.bf16.mxu0 %v5550_v0  ;;  %4584 = vmatprep.mubr.msk.f32.mxu0 %vm5551_vm0, %v5552_v8 }
  0x1d   :  { %5114 = vmatpush3.bf16.msra.mxu1 %v5773_v37  ;;  %4595 = vmatprep.mubr.msk.f32.mxu1 %vm5551_vm0, %v5552_v8 }
  0x1e   :  { %5115 = vmatprep.subr.bf16.mxu1 %v5550_v0 }
  0x1f   :  { %5111 = vmatpush3.bf16.msra.mxu0 %v5784_v40 }
  0x20   :  { %5118 = vmatprep.subr.bf16.mxu0 %v5550_v0 }
  0x21   :  { %5117 = vmatpush3.bf16.msra.mxu1 %v5792_v42 }
  0x22   :  { %4585 = vmatmul.mubr.f32.vlgmr.msra.gmra.mrb[4].mxu0 %v5552_v8  ;;  %5124 = vmatprep.subr.bf16.mxu1 %v5550_v0 }
  0x23   :  { %5120 = vmatpush3.bf16.msra.mxu0 %v5660_v4  ;;  %4606 = vmatprep.mubr.msk.f32.mxu0 %vm5551_vm0, %v5552_v8 }
  0x24   :  { %4596 = vmatmul.mubr.f32.vlgmr.msra.gmra.mrb[4].mxu1 %v5552_v8  ;;  %5121 = vmatprep.subr.bf16.mxu0 %v5550_v0 }
  0x25   :  { %5126 = vmatpush3.bf16.msra.mxu1 %v5675_v9  ;;  %4617 = vmatprep.mubr.msk.f32.mxu1 %vm5551_vm0, %v5552_v8 }
  0x26   :  { %5127 = vmatprep.subr.bf16.mxu1 %v5550_v0 }
  0x27   :  { %5123 = vmatpush3.bf16.msra.mxu0 %v5686_v13 }
  0x28   :  { %5130 = vmatprep.subr.bf16.mxu0 %v5550_v0 }
  0x29   :  { %5129 = vmatpush3.bf16.msra.mxu1 %v5690_v14 }
  0x2a   :  { %5136 = vmatprep.subr.bf16.mxu1 %v5550_v0 }
  0x84   :  { %v5854_v47 = vpop.permute.xlu0 %339 }
  0x85   :  { %vm341_vm9 = vcmp.eq.s32.totalorder %v5854_v47, 1 }
  0xe5   :  { %v171_v49 = vpop.f32.mrb[0].mxu0 }
  0xe6   :  { %v175_v50 = vadd.f32 %v171_v49, %v98_v48  ;;  %v248_v52 = vpop.f32.mrb[0].mxu1  ;;  %v4542_v53 = vpop.f32.mrb[1].mxu0 }
  0xe7   :  { %v4553_v54 = vpop.f32.mrb[1].mxu1  ;;  %v252_v56 = vadd.f32 %v248_v52, %v99_v51 }
  0xe8   :  { %v4163_v55 = vmul.f32 -1.442695, %v175_v50 }
  0xe9   :  { %v4164_v58 = vmul.f32 -1.442695, %v252_v56  ;;  %v5875_v56 = vpop.permute.xlu0 %583 }
  0xea   :  { %5388 = vpow2.f32 %v4163_v55  ;;  %vm585_vm11 = vcmp.eq.s32.totalorder %v5875_v56, 1  ;;  %v4281_v56 = vld [vmem:[%s6495_s17] ss:$0 sm:$0xff] }
  0xeb   :  { %5390 = vpow2.f32 %v4164_v58  ;;  %v4170_v58 = vld [vmem:[%s6485_s1 + $0x8] sm:$0xff] }
  0xed   :  { %v325_v59 = vpop.f32.mrb[2].mxu0 }
  0xee   :  { %v415_v60 = vpop.f32.mrb[2].mxu1  ;;  %v4564_v61 = vpop.f32.mrb[3].mxu0  ;;  %v326_v23 = vadd.f32 %v5839_v18, %v325_v59 }
  0xef   :  { %v419_v62 = vadd.f32 %v4165_v57, %v415_v60  ;;  %v4575_v63 = vpop.f32.mrb[3].mxu1 }
  0xf1   :  { %v4168_v1 = vmul.f32 -1.442695, %v419_v62  ;;  %v4171_v62 = vld [vmem:[%s6486_s2 + $0x8] sm:$0xff] }
  0xf3   :  { %5392 = vpow2.f32 %v4168_v1 }
  0xf4   :  { %v5389_v3 = vpop.eup %5388 }
  0xf5   :  { %v179_v5 = vadd.f32 1.0, %v5389_v3  ;;  %v492_v6 = vpop.f32.mrb[4].mxu0  ;;  %v5391_v16 = vpop.eup %5390 }
  0xf6   :  { %v496_v7 = vadd.f32 %v4166_v2, %v492_v6  ;;  %v4586_v10 = vpop.f32.mrb[5].mxu0  ;;  %v256_v21 = vadd.f32 1.0, %v5391_v16 }
  0xf7   :  { %5394 = vrcp.f32 %v179_v5  ;;  %v569_v11 = vpop.f32.mrb[4].mxu1  ;;  %v4178_v5 = vld [vmem:[%s6487_s4 + $0x30] sm:$0xff] }
  0xf8   :  { %v4169_v12 = vmul.f32 -1.442695, %v496_v7  ;;  %v4597_v15 = vpop.f32.mrb[5].mxu1  ;;  %v570_v34 = vadd.f32 %v5848_v31, %v569_v11 }
  0xfa   :  { %5396 = vpow2.f32 %v4169_v12 }
  0xfd   :  { %v5393_v17 = vpop.eup %5392 }
  0xfe   :  { %v423_v22 = vadd.f32 1.0, %v5393_v17  ;;  %v4179_v17 = vld [vmem:[%s6488_s5 + $0x30] sm:$0xff] }
 0x100   :  { %5398 = vrcp.f32 %v423_v22 }
 0x101   :  { %v5395_v24 = vpop.eup %5394  ;;  %5400 = vrcp.f32 %v256_v21 }
 0x102   :  { %v329_v27 = vmul.f32 %v5395_v24, %v326_v23 }
 0x104   :  { %v5397_v29 = vpop.eup %5396  ;;  %v330_v30 = vadd.f32 %v329_v27, %v100_v25 }
 0x105   :  { %v500_v32 = vadd.f32 1.0, %v5397_v29 }
 0x106   :  { %5402 = vtanh.f32 %v330_v30 }
 0x107   :  { %5404 = vrcp.f32 %v500_v32 }
 0x10a   :  { %v5399_v35 = vpop.eup %5398 }
 0x10b   :  { %v573_v38 = vmul.f32 %v5399_v35, %v570_v34  ;;  %v5401_v39 = vpop.eup %5400 }
 0x10c   :  { %v332_v43 = vsub.f32 1.0, %v5401_v39  ;;  %v334_v46 = vmul.f32 0.0, %v5401_v39 }
 0x10d   :  { %v574_v41 = vadd.f32 %v4167_v36, %v573_v38 }
 0x10f   :  { %5406 = vtanh.f32 %v574_v41  ;;  %v4172_v41 = vld [vmem:[%s6490_s3 + $0x8] sm:$0xff] }
 0x110   :  { %v5403_v44 = vpop.eup %5402 }
 0x111   :  { %v333_v45 = vmul.f32 %v5403_v44, %v332_v43  ;;  %v5405_v48 = vpop.eup %5404 }
 0x112   :  { %v576_v51 = vsub.f32 1.0, %v5405_v48  ;;  %v578_v54 = vmul.f32 0.0, %v5405_v48 }
 0x113   :  { %v335_v49 = vadd.f32 %v334_v46, %v333_v45 }
 0x115   :  { %v5859_v50 = vsel %vm341_vm9, %v335_v49, 0.0 }
 0x116   :  { %4607 = vmatmul.mubr.msk.f32.vlgmr.msra.gmra.mrb[6].mxu0 %vm101_vm10, %v5859_v50  ;;  %4618 = vmatmul.mubr.msk.f32.vlgmr.msra.gmra.mrb[6].mxu1 %vm101_vm10, %v5859_v50 }
 0x117   :  { %5132 = vmatpush3.bf16.msra.mxu0 %v5706_v19  ;;  %5138 = vmatpush3.bf16.msra.mxu1 %v5709_v20 }
 0x118   :  { %5133 = vmatprep.subr.bf16.mxu0 %v5550_v0  ;;  %5139 = vmatprep.subr.bf16.mxu1 %v5550_v0 }
 0x119   :  { %v5407_v52 = vpop.eup %5406  ;;  %4628 = vmatprep.mubr.msk.f32.mxu0 %vm5551_vm0, %v5552_v8  ;;  %4639 = vmatprep.mubr.msk.f32.mxu1 %vm5551_vm0, %v5552_v8 }
 0x11a   :  { %v577_v53 = vmul.f32 %v5407_v52, %v576_v51  ;;  %v4180_v51 = vld [vmem:[%s6492_s6 + $0x30] sm:$0xff] }
 0x11b   :  { %5135 = vmatpush3.bf16.msra.mxu0 %v5734_v26  ;;  %5141 = vmatpush3.bf16.msra.mxu1 %v5738_v28 }
 0x11c   :  { %v579_v55 = vadd.f32 %v578_v54, %v577_v53  ;;  %5142 = vmatprep.subr.bf16.mxu0 %v5550_v0  ;;  %5148 = vmatprep.subr.bf16.mxu1 %v5550_v0 }
 0x11e   :  { %v5882_v57 = vsel %vm585_vm11, %v579_v55, 0.0  ;;  %4629 = vmatmul.mubr.msk.f32.vlgmr.msra.gmra.mrb[8].mxu0 %vm101_vm10, %v5859_v50 }
 0x11f   :  { %4640 = vmatmul.mubr.msk.f32.vlgmr.msra.gmra.mrb[8].mxu1 %vm101_vm10, %v5882_v57  ;;  %5144 = vmatpush3.bf16.msra.mxu0 %v5760_v33 }
 0x120   :  { %5150 = vmatpush3.bf16.msra.mxu1 %v5773_v37  ;;  %5145 = vmatprep.subr.bf16.mxu0 %v5550_v0 }
 0x121   :  { %5151 = vmatprep.subr.bf16.mxu1 %v5550_v0  ;;  %4650 = vmatprep.mubr.msk.f32.mxu0 %vm5551_vm0, %v5552_v8 }
 0x122   :  { %4661 = vmatprep.mubr.msk.f32.mxu1 %vm5551_vm0, %v5552_v8 }
 0x123   :  { %5147 = vmatpush3.bf16.msra.mxu0 %v5784_v40 }
 0x124   :  { %5153 = vmatpush3.bf16.msra.mxu1 %v5792_v42  ;;  %5154 = vmatprep.subr.bf16.mxu0 %v5550_v0 }
 0x125   :  { %5160 = vmatprep.subr.bf16.mxu1 %v5550_v0 }
 0x126   :  { %4651 = vmatmul.mubr.msk.f32.vlgmr.msra.gmra.mrb[10].mxu0 %vm101_vm10, %v5882_v57 }
 0x127   :  { %4662 = vmatmul.mubr.msk.f32.vlgmr.msra.gmra.mrb[10].mxu1 %vm101_vm10, %v5882_v57  ;;  %5156 = vmatpush3.bf16.msra.mxu0 %v5660_v4 }
 0x128   :  { %5162 = vmatpush3.bf16.msra.mxu1 %v5675_v9  ;;  %5157 = vmatprep.subr.bf16.mxu0 %v5550_v0 }
 0x129   :  { %5163 = vmatprep.subr.bf16.mxu1 %v5550_v0  ;;  %4672 = vmatprep.mubr.msk.f32.mxu0 %vm5551_vm0, %v5552_v8 }
 0x12a   :  { %4683 = vmatprep.mubr.msk.f32.mxu1 %vm5551_vm0, %v5552_v8 }
 0x12b   :  { %5159 = vmatpush3.bf16.msra.mxu0 %v5686_v13 }
 0x12c   :  { %5165 = vmatpush3.bf16.msra.mxu1 %v5690_v14  ;;  %5166 = vmatprep.subr.bf16.mxu0 %v5550_v0 }
 0x12d   :  { %5172 = vmatprep.subr.bf16.mxu1 %v5550_v0 }
 0x1e9   :  { %v662_v59 = vpop.f32.mrb[6].mxu0  ;;  %v739_v60 = vpop.f32.mrb[6].mxu1 }
 0x1ea   :  { %v666_v61 = vadd.f32 %v4170_v58, %v662_v59  ;;  %v4608_v63 = vpop.f32.mrb[7].mxu0  ;;  %v4619_v1 = vpop.f32.mrb[7].mxu1  ;;  %v743_v3 = vadd.f32 %v4171_v62, %v739_v60 }
 0x1eb   :  { %v5936_v59 = vpop.permute.xlu1 %830 }
 0x1ec   :  { %v4174_v2 = vmul.f32 -1.442695, %v666_v61  ;;  %v4176_v6 = vmul.f32 -1.442695, %v743_v3  ;;  %vm832_vm12 = vcmp.eq.s32.totalorder %v5936_v59, 1  ;;  %v3995_v59 = vld [vmem:[%s6494_s15 + $0x8] sm:$0xff] }
 0x1ee   :  { %5408 = vpow2.f32 %v4174_v2 }
 0x1ef   :  { %5410 = vpow2.f32 %v4176_v6  ;;  %v5960_v6 = vpop.permute.xlu1 %1077 }
 0x1f0   :  { %vm1079_vm13 = vcmp.eq.s32.totalorder %v5960_v6, 1 }
 0x1f1   :  { %v816_v7 = vpop.f32.mrb[8].mxu0 }
 0x1f2   :  { %v4630_v10 = vpop.f32.mrb[9].mxu0  ;;  %v909_v11 = vpop.f32.mrb[8].mxu1  ;;  %v817_v38 = vadd.f32 %v5839_v18, %v816_v7 }
 0x1f3   :  { %v913_v12 = vadd.f32 %v4178_v5, %v909_v11  ;;  %v4641_v15 = vpop.f32.mrb[9].mxu1 }
 0x1f5   :  { %v4182_v16 = vmul.f32 -1.442695, %v913_v12 }
 0x1f7   :  { %5412 = vpow2.f32 %v4182_v16  ;;  %v4187_v16 = vld [vmem:[%s6486_s2 + $0x10] sm:$0xff] }
 0x1f8   :  { %v5409_v21 = vpop.eup %5408 }
 0x1f9   :  { %v670_v22 = vadd.f32 1.0, %v5409_v21  ;;  %v986_v23 = vpop.f32.mrb[10].mxu0  ;;  %v5411_v32 = vpop.eup %5410 }
 0x1fa   :  { %v990_v24 = vadd.f32 %v4179_v17, %v986_v23  ;;  %v1063_v25 = vpop.f32.mrb[10].mxu1  ;;  %v4652_v27 = vpop.f32.mrb[11].mxu0  ;;  %v747_v35 = vadd.f32 1.0, %v5411_v32 }
 0x1fb   :  { %5414 = vrcp.f32 %v670_v22  ;;  %v4663_v29 = vpop.f32.mrb[11].mxu1  ;;  %v1064_v48 = vadd.f32 %v5848_v31, %v1063_v25 }
 0x1fc   :  { %v4184_v30 = vmul.f32 -1.442695, %v990_v24  ;;  %v4194_v24 = vld [vmem:[%s6487_s4 + $0x28] sm:$0xff] }
 0x1fe   :  { %5416 = vpow2.f32 %v4184_v30 }
 0x201   :  { %v5413_v34 = vpop.eup %5412 }
 0x202   :  { %v917_v36 = vadd.f32 1.0, %v5413_v34 }
 0x204   :  { %5418 = vrcp.f32 %v917_v36  ;;  %v4195_v36 = vld [vmem:[%s6488_s5 + $0x28] sm:$0xff] }
 0x205   :  { %v5415_v39 = vpop.eup %5414  ;;  %5420 = vrcp.f32 %v747_v35 }
 0x206   :  { %v820_v43 = vmul.f32 %v5415_v39, %v817_v38 }
 0x208   :  { %v5417_v44 = vpop.eup %5416  ;;  %v821_v45 = vadd.f32 %v4172_v41, %v820_v43 }
 0x209   :  { %v994_v46 = vadd.f32 1.0, %v5417_v44 }
 0x20a   :  { %5422 = vtanh.f32 %v821_v45 }
 0x20b   :  { %5424 = vrcp.f32 %v994_v46 }
 0x20e   :  { %v5419_v49 = vpop.eup %5418 }
 0x20f   :  { %v1067_v52 = vmul.f32 %v5419_v49, %v1064_v48  ;;  %v5421_v53 = vpop.eup %5420 }
 0x210   :  { %v823_v55 = vsub.f32 1.0, %v5421_v53  ;;  %v825_v61 = vmul.f32 %v5421_v53, %v5859_v50 }
 0x211   :  { %v1068_v54 = vadd.f32 %v4180_v51, %v1067_v52 }
 0x213   :  { %5426 = vtanh.f32 %v1068_v54 }
 0x214   :  { %v5423_v58 = vpop.eup %5422 }
 0x215   :  { %v824_v60 = vmul.f32 %v5423_v58, %v823_v55  ;;  %v5425_v63 = vpop.eup %5424  ;;  %v4188_v58 = vld [vmem:[%s6490_s3 + $0x10] sm:$0xff] }
 0x216   :  { %v1070_v2 = vsub.f32 1.0, %v5425_v63  ;;  %v1072_v5 = vmul.f32 %v5425_v63, %v5882_v57 }
 0x217   :  { %v826_v62 = vadd.f32 %v825_v61, %v824_v60 }
 0x219   :  { %v5943_v1 = vsel %vm832_vm12, %v826_v62, %v5859_v50 }
 0x21a   :  { %4673 = vmatmul.mubr.msk.f32.vlgmr.msra.gmra.mrb[12].mxu0 %vm101_vm10, %v5943_v1  ;;  %4684 = vmatmul.mubr.msk.f32.vlgmr.msra.gmra.mrb[12].mxu1 %vm101_vm10, %v5943_v1 }
 0x21b   :  { %5168 = vmatpush3.bf16.msra.mxu0 %v5706_v19  ;;  %5174 = vmatpush3.bf16.msra.mxu1 %v5709_v20 }
 0x21c   :  { %5169 = vmatprep.subr.bf16.mxu0 %v5550_v0  ;;  %5175 = vmatprep.subr.bf16.mxu1 %v5550_v0 }
 0x21d   :  { %v5427_v3 = vpop.eup %5426  ;;  %4694 = vmatprep.mubr.msk.f32.mxu0 %vm5551_vm0, %v5552_v8  ;;  %4705 = vmatprep.mubr.msk.f32.mxu1 %vm5551_vm0, %v5552_v8 }
 0x21e   :  { %v1071_v50 = vmul.f32 %v5427_v3, %v1070_v2 }
 0x21f   :  { %5171 = vmatpush3.bf16.msra.mxu0 %v5734_v26  ;;  %5177 = vmatpush3.bf16.msra.mxu1 %v5738_v28 }
 0x220   :  { %v1073_v7 = vadd.f32 %v1072_v5, %v1071_v50  ;;  %5178 = vmatprep.subr.bf16.mxu0 %v5550_v0  ;;  %5184 = vmatprep.subr.bf16.mxu1 %v5550_v0  ;;  %v4196_v50 = vld [vmem:[%s6492_s6 + $0x28] sm:$0xff] }
 0x222   :  { %v5968_v10 = vsel %vm1079_vm13, %v1073_v7, %v5882_v57  ;;  %4695 = vmatmul.mubr.msk.f32.vlgmr.msra.gmra.mrb[14].mxu0 %vm101_vm10, %v5943_v1  ;;  %v4186_v57 = vld [vmem:[%s6485_s1 + $0x10] sm:$0xff] }
 0x223   :  { %4706 = vmatmul.mubr.msk.f32.vlgmr.msra.gmra.mrb[14].mxu1 %vm101_vm10, %v5968_v10  ;;  %5180 = vmatpush3.bf16.msra.mxu0 %v5760_v33 }
 0x224   :  { %5186 = vmatpush3.bf16.msra.mxu1 %v5773_v37  ;;  %5181 = vmatprep.subr.bf16.mxu0 %v5550_v0 }
 0x225   :  { %5187 = vmatprep.subr.bf16.mxu1 %v5550_v0  ;;  %4716 = vmatprep.mubr.msk.f32.mxu0 %vm5551_vm0, %v5552_v8 }
 0x226   :  { %4727 = vmatprep.mubr.msk.f32.mxu1 %vm5551_vm0, %v5552_v8 }
 0x227   :  { %5183 = vmatpush3.bf16.msra.mxu0 %v5784_v40 }
 0x228   :  { %5189 = vmatpush3.bf16.msra.mxu1 %v5792_v42  ;;  %5190 = vmatprep.subr.bf16.mxu0 %v5550_v0 }
 0x229   :  { %5196 = vmatprep.subr.bf16.mxu1 %v5550_v0 }
 0x22a   :  { %4717 = vmatmul.mubr.msk.f32.vlgmr.msra.gmra.mrb[16].mxu0 %vm101_vm10, %v5968_v10 }
 0x22b   :  { %4728 = vmatmul.mubr.msk.f32.vlgmr.msra.gmra.mrb[16].mxu1 %vm101_vm10, %v5968_v10  ;;  %5192 = vmatpush3.bf16.msra.mxu0 %v5660_v4 }
 0x22c   :  { %5198 = vmatpush3.bf16.msra.mxu1 %v5675_v9  ;;  %5193 = vmatprep.subr.bf16.mxu0 %v5550_v0 }
 0x22d   :  { %5199 = vmatprep.subr.bf16.mxu1 %v5550_v0  ;;  %4738 = vmatprep.mubr.msk.f32.mxu0 %vm5551_vm0, %v5552_v8 }
 0x22e   :  { %4749 = vmatprep.mubr.msk.f32.mxu1 %vm5551_vm0, %v5552_v8 }
 0x22f   :  { %5195 = vmatpush3.bf16.msra.mxu0 %v5686_v13 }
 0x230   :  { %5201 = vmatpush3.bf16.msra.mxu1 %v5690_v14  ;;  %5202 = vmatprep.subr.bf16.mxu0 %v5550_v0 }
 0x231   :  { %5208 = vmatprep.subr.bf16.mxu1 %v5550_v0 }
 0x2ed   :  { %v1156_v11 = vpop.f32.mrb[12].mxu0  ;;  %v1233_v12 = vpop.f32.mrb[12].mxu1 }
 0x2ee   :  { %v1160_v15 = vadd.f32 %v4186_v57, %v1156_v11  ;;  %v4674_v17 = vpop.f32.mrb[13].mxu0  ;;  %v4685_v21 = vpop.f32.mrb[13].mxu1  ;;  %v1237_v23 = vadd.f32 %v4187_v16, %v1233_v12 }
 0x2ef   :  { %v6023_v17 = vpop.permute.xlu0 %1324 }
 0x2f0   :  { %v4190_v22 = vmul.f32 -1.442695, %v1160_v15  ;;  %v4192_v25 = vmul.f32 -1.442695, %v1237_v23  ;;  %vm1326_vm14 = vcmp.eq.s32.totalorder %v6023_v17, 1 }
 0x2f2   :  { %5428 = vpow2.f32 %v4190_v22 }
 0x2f3   :  { %5430 = vpow2.f32 %v4192_v25 }
 0x2f5   :  { %v1310_v27 = vpop.f32.mrb[14].mxu0 }
 0x2f6   :  { %v4696_v29 = vpop.f32.mrb[15].mxu0  ;;  %v1403_v30 = vpop.f32.mrb[14].mxu1  ;;  %v1311_v54 = vadd.f32 %v5839_v18, %v1310_v27 }
 0x2f7   :  { %v1407_v32 = vadd.f32 %v4194_v24, %v1403_v30  ;;  %v4707_v34 = vpop.f32.mrb[15].mxu1  ;;  %v6046_v29 = vpop.permute.xlu1 %1571 }
 0x2f8   :  { %vm1573_vm15 = vcmp.eq.s32.totalorder %v6046_v29, 1 }
 0x2f9   :  { %v4198_v35 = vmul.f32 -1.442695, %v1407_v32 }
 0x2fb   :  { %5432 = vpow2.f32 %v4198_v35 }
 0x2fc   :  { %v5429_v38 = vpop.eup %5428 }
 0x2fd   :  { %v1164_v39 = vadd.f32 1.0, %v5429_v38  ;;  %v1480_v41 = vpop.f32.mrb[16].mxu0  ;;  %v5431_v49 = vpop.eup %5430  ;;  %v4203_v38 = vld [vmem:[%s6486_s2 + $0x18] sm:$0xff] }
 0x2fe   :  { %v1484_v43 = vadd.f32 %v4195_v36, %v1480_v41  ;;  %v1557_v44 = vpop.f32.mrb[16].mxu1  ;;  %v4718_v45 = vpop.f32.mrb[17].mxu0  ;;  %v1241_v52 = vadd.f32 1.0, %v5431_v49 }
 0x2ff   :  { %5434 = vrcp.f32 %v1164_v39  ;;  %v4729_v46 = vpop.f32.mrb[17].mxu1  ;;  %v1558_v2 = vadd.f32 %v5848_v31, %v1557_v44  ;;  %v4210_v45 = vld [vmem:[%s6487_s4 + $0x20] sm:$0xff] }
 0x300   :  { %v4200_v48 = vmul.f32 -1.442695, %v1484_v43 }
 0x302   :  { %5436 = vpow2.f32 %v4200_v48 }
 0x305   :  { %v5433_v51 = vpop.eup %5432 }
 0x306   :  { %v1411_v53 = vadd.f32 1.0, %v5433_v51 }
 0x308   :  { %5438 = vrcp.f32 %v1411_v53 }
 0x309   :  { %v5435_v55 = vpop.eup %5434  ;;  %5440 = vrcp.f32 %v1241_v52 }
 0x30a   :  { %v1314_v60 = vmul.f32 %v5435_v55, %v1311_v54  ;;  %v4211_v55 = vld [vmem:[%s6488_s5 + $0x20] sm:$0xff] }
 0x30c   :  { %v5437_v61 = vpop.eup %5436  ;;  %v1315_v62 = vadd.f32 %v4188_v58, %v1314_v60 }
 0x30d   :  { %v1488_v63 = vadd.f32 1.0, %v5437_v61 }
 0x30e   :  { %5442 = vtanh.f32 %v1315_v62 }
 0x30f   :  { %5444 = vrcp.f32 %v1488_v63 }
 0x312   :  { %v5439_v3 = vpop.eup %5438 }
 0x313   :  { %v1561_v5 = vmul.f32 %v5439_v3, %v1558_v2  ;;  %v5441_v7 = vpop.eup %5440 }
 0x314   :  { %v1317_v11 = vsub.f32 1.0, %v5441_v7  ;;  %v1319_v16 = vmul.f32 %v5441_v7, %v5943_v1 }
 0x315   :  { %v1562_v57 = vadd.f32 %v4196_v50, %v1561_v5 }
 0x317   :  { %5446 = vtanh.f32 %v1562_v57 }
 0x318   :  { %v5443_v12 = vpop.eup %5442 }
 0x319   :  { %v1318_v15 = vmul.f32 %v5443_v12, %v1317_v11  ;;  %v5445_v22 = vpop.eup %5444 }
 0x31a   :  { %v1564_v24 = vsub.f32 1.0, %v5445_v22  ;;  %v1566_v27 = vmul.f32 %v5445_v22, %v5968_v10 }
 0x31b   :  { %v1320_v21 = vadd.f32 %v1319_v16, %v1318_v15  ;;  %v4204_v16 = vld [vmem:[%s6490_s3 + $0x18] sm:$0xff] }
 0x31d   :  { %v6029_v23 = vsel %vm1326_vm14, %v1320_v21, %v5943_v1 }
 0x31e   :  { %4739 = vmatmul.mubr.msk.f32.vlgmr.msra.gmra.mrb[18].mxu0 %vm101_vm10, %v6029_v23  ;;  %4750 = vmatmul.mubr.msk.f32.vlgmr.msra.gmra.mrb[18].mxu1 %vm101_vm10, %v6029_v23 }
 0x31f   :  { %5204 = vmatpush3.bf16.msra.mxu0 %v5706_v19  ;;  %5210 = vmatpush3.bf16.msra.mxu1 %v5709_v20 }
 0x320   :  { %5205 = vmatprep.subr.bf16.mxu0 %v5550_v0  ;;  %5211 = vmatprep.subr.bf16.mxu1 %v5550_v0 }
 0x321   :  { %v5447_v25 = vpop.eup %5446  ;;  %4760 = vmatprep.mubr.msk.f32.mxu0 %vm5551_vm0, %v5552_v8  ;;  %4771 = vmatprep.mubr.msk.f32.mxu1 %vm5551_vm0, %v5552_v8 }
 0x322   :  { %v1565_v1 = vmul.f32 %v5447_v25, %v1564_v24 }
 0x323   :  { %5207 = vmatpush3.bf16.msra.mxu0 %v5734_v26  ;;  %5213 = vmatpush3.bf16.msra.mxu1 %v5738_v28 }
 0x324   :  { %5214 = vmatprep.subr.bf16.mxu0 %v5550_v0  ;;  %5220 = vmatprep.subr.bf16.mxu1 %v5550_v0  ;;  %v1567_v30 = vadd.f32 %v1566_v27, %v1565_v1 }
 0x326   :  { %4761 = vmatmul.mubr.msk.f32.vlgmr.msra.gmra.mrb[20].mxu0 %vm101_vm10, %v6029_v23  ;;  %v6056_v32 = vsel %vm1573_vm15, %v1567_v30, %v5968_v10  ;;  %v4202_v10 = vld [vmem:[%s6485_s1 + $0x18] sm:$0xff]  ;;  %v4212_v30 = vld [vmem:[%s6492_s6 + $0x20] sm:$0xff] }
 0x327   :  { %4772 = vmatmul.mubr.msk.f32.vlgmr.msra.gmra.mrb[20].mxu1 %vm101_vm10, %v6056_v32  ;;  %5216 = vmatpush3.bf16.msra.mxu0 %v5760_v33 }
 0x328   :  { %5222 = vmatpush3.bf16.msra.mxu1 %v5773_v37  ;;  %5217 = vmatprep.subr.bf16.mxu0 %v5550_v0 }
 0x329   :  { %5223 = vmatprep.subr.bf16.mxu1 %v5550_v0  ;;  %4782 = vmatprep.mubr.msk.f32.mxu0 %vm5551_vm0, %v5552_v8 }
 0x32a   :  { %4793 = vmatprep.mubr.msk.f32.mxu1 %vm5551_vm0, %v5552_v8 }
 0x32b   :  { %5219 = vmatpush3.bf16.msra.mxu0 %v5784_v40 }
 0x32c   :  { %5225 = vmatpush3.bf16.msra.mxu1 %v5792_v42  ;;  %5226 = vmatprep.subr.bf16.mxu0 %v5550_v0 }
 0x32d   :  { %5232 = vmatprep.subr.bf16.mxu1 %v5550_v0 }
 0x32e   :  { %4783 = vmatmul.mubr.msk.f32.vlgmr.msra.gmra.mrb[22].mxu0 %vm101_vm10, %v6056_v32 }
 0x32f   :  { %4794 = vmatmul.mubr.msk.f32.vlgmr.msra.gmra.mrb[22].mxu1 %vm101_vm10, %v6056_v32  ;;  %5228 = vmatpush3.bf16.msra.mxu0 %v5660_v4 }
 0x330   :  { %5234 = vmatpush3.bf16.msra.mxu1 %v5675_v9  ;;  %5229 = vmatprep.subr.bf16.mxu0 %v5550_v0 }
 0x331   :  { %5235 = vmatprep.subr.bf16.mxu1 %v5550_v0  ;;  %4804 = vmatprep.mubr.msk.f32.mxu0 %vm5551_vm0, %v5552_v8 }
 0x332   :  { %4815 = vmatprep.mubr.msk.f32.mxu1 %vm5551_vm0, %v5552_v8 }
 0x333   :  { %5231 = vmatpush3.bf16.msra.mxu0 %v5686_v13 }
 0x334   :  { %5237 = vmatpush3.bf16.msra.mxu1 %v5690_v14  ;;  %5238 = vmatprep.subr.bf16.mxu0 %v5550_v0 }
 0x335   :  { %5244 = vmatprep.subr.bf16.mxu1 %v5550_v0 }
 0x3f1   :  { %v1650_v34 = vpop.f32.mrb[18].mxu0  ;;  %v1727_v35 = vpop.f32.mrb[18].mxu1 }
 0x3f2   :  { %v1654_v36 = vadd.f32 %v4202_v10, %v1650_v34  ;;  %v4740_v39 = vpop.f32.mrb[19].mxu0  ;;  %v4751_v41 = vpop.f32.mrb[19].mxu1  ;;  %v1731_v44 = vadd.f32 %v4203_v38, %v1727_v35 }
 0x3f3   :  { %v6108_v39 = vpop.permute.xlu0 %1818 }
 0x3f4   :  { %v4206_v43 = vmul.f32 -1.442695, %v1654_v36  ;;  %v4208_v46 = vmul.f32 -1.442695, %v1731_v44  ;;  %vm1820_vm1 = vcmp.eq.s32.totalorder %v6108_v39, 1  ;;  %v4234_v39 = vld [vmem:[%s6485_s1 + $0x28] sm:$0xff] }
 0x3f6   :  { %5448 = vpow2.f32 %v4206_v43 }
 0x3f7   :  { %5450 = vpow2.f32 %v4208_v46 }
 0x3f9   :  { %v1804_v48 = vpop.f32.mrb[20].mxu0 }
 0x3fa   :  { %v4762_v49 = vpop.f32.mrb[21].mxu0  ;;  %v1897_v51 = vpop.f32.mrb[20].mxu1  ;;  %v1805_v12 = vadd.f32 %v5839_v18, %v1804_v48 }
 0x3fb   :  { %v1901_v52 = vadd.f32 %v4210_v45, %v1897_v51  ;;  %v4773_v53 = vpop.f32.mrb[21].mxu1 }
 0x3fd   :  { %v4214_v54 = vmul.f32 -1.442695, %v1901_v52 }
 0x3ff   :  { %5452 = vpow2.f32 %v4214_v54 }
 0x400   :  { %v5449_v58 = vpop.eup %5448 }
 0x401   :  { %v1658_v60 = vadd.f32 1.0, %v5449_v58  ;;  %v1974_v61 = vpop.f32.mrb[22].mxu0  ;;  %v5451_v5 = vpop.eup %5450 }
 0x402   :  { %v1978_v62 = vadd.f32 %v4211_v55, %v1974_v61  ;;  %v2051_v63 = vpop.f32.mrb[22].mxu1  ;;  %v4784_v2 = vpop.f32.mrb[23].mxu0  ;;  %v1735_v57 = vadd.f32 1.0, %v5451_v5  ;;  %v4219_v61 = vld [vmem:[%s6486_s2 + $0x20] sm:$0xff] }
 0x403   :  { %5454 = vrcp.f32 %v1658_v60  ;;  %v4795_v3 = vpop.f32.mrb[23].mxu1  ;;  %v2052_v1 = vadd.f32 %v5848_v31, %v2051_v63 }
 0x404   :  { %v4216_v50 = vmul.f32 -1.442695, %v1978_v62 }
 0x406   :  { %5456 = vpow2.f32 %v4216_v50  ;;  %v4226_v50 = vld [vmem:[%s6487_s4 + $0x18] sm:$0xff] }
 0x409   :  { %v5453_v7 = vpop.eup %5452 }
 0x40a   :  { %v1905_v11 = vadd.f32 1.0, %v5453_v7 }
 0x40c   :  { %5458 = vrcp.f32 %v1905_v11 }
 0x40d   :  { %v5455_v15 = vpop.eup %5454  ;;  %5460 = vrcp.f32 %v1735_v57 }
 0x40e   :  { %v1808_v21 = vmul.f32 %v5455_v15, %v1805_v12 }
 0x410   :  { %v5457_v22 = vpop.eup %5456  ;;  %v1809_v24 = vadd.f32 %v4204_v16, %v1808_v21  ;;  %v4227_v21 = vld [vmem:[%s6488_s5 + $0x18] sm:$0xff] }
 0x411   :  { %v1982_v25 = vadd.f32 1.0, %v5457_v22 }
 0x412   :  { %5462 = vtanh.f32 %v1809_v24 }
 0x413   :  { %5464 = vrcp.f32 %v1982_v25 }
 0x416   :  { %v5459_v27 = vpop.eup %5458 }
 0x417   :  { %v2055_v10 = vmul.f32 %v5459_v27, %v2052_v1  ;;  %v5461_v34 = vpop.eup %5460 }
 0x418   :  { %v1811_v36 = vsub.f32 1.0, %v5461_v34  ;;  %v1813_v43 = vmul.f32 %v5461_v34, %v6029_v23 }
 0x419   :  { %v2056_v35 = vadd.f32 %v4212_v30, %v2055_v10 }
 0x41b   :  { %5466 = vtanh.f32 %v2056_v35 }
 0x41c   :  { %v5463_v38 = vpop.eup %5462 }
 0x41d   :  { %v1812_v41 = vmul.f32 %v5463_v38, %v1811_v36  ;;  %v5465_v45 = vpop.eup %5464 }
 0x41e   :  { %v2058_v48 = vsub.f32 1.0, %v5465_v45  ;;  %v2060_v52 = vmul.f32 %v5465_v45, %v6056_v32  ;;  %v4220_v45 = vld [vmem:[%s6490_s3 + $0x20] sm:$0xff] }
 0x41f   :  { %v1814_v44 = vadd.f32 %v1813_v43, %v1812_v41 }
 0x421   :  { %v6115_v46 = vsel %vm1820_vm1, %v1814_v44, %v6029_v23  ;;  %v6129_v23 = vpop.permute.xlu1 %2065 }
 0x422   :  { %4805 = vmatmul.mubr.msk.f32.vlgmr.msra.gmra.mrb[24].mxu0 %vm101_vm10, %v6115_v46  ;;  %4816 = vmatmul.mubr.msk.f32.vlgmr.msra.gmra.mrb[24].mxu1 %vm101_vm10, %v6115_v46  ;;  %vm2067_vm2 = vcmp.eq.s32.totalorder %v6129_v23, 1 }
 0x423   :  { %5240 = vmatpush3.bf16.msra.mxu0 %v5706_v19  ;;  %5246 = vmatpush3.bf16.msra.mxu1 %v5709_v20 }
 0x424   :  { %5241 = vmatprep.subr.bf16.mxu0 %v5550_v0  ;;  %5247 = vmatprep.subr.bf16.mxu1 %v5550_v0 }
 0x425   :  { %v5467_v49 = vpop.eup %5466  ;;  %4826 = vmatprep.mubr.msk.f32.mxu0 %vm5551_vm0, %v5552_v8  ;;  %4837 = vmatprep.mubr.msk.f32.mxu1 %vm5551_vm0, %v5552_v8 }
 0x426   :  { %v2059_v51 = vmul.f32 %v5467_v49, %v2058_v48 }
 0x427   :  { %5243 = vmatpush3.bf16.msra.mxu0 %v5734_v26  ;;  %5249 = vmatpush3.bf16.msra.mxu1 %v5738_v28 }
 0x428   :  { %5250 = vmatprep.subr.bf16.mxu0 %v5550_v0  ;;  %5256 = vmatprep.subr.bf16.mxu1 %v5550_v0  ;;  %v2061_v53 = vadd.f32 %v2060_v52, %v2059_v51 }
 0x42a   :  { %4827 = vmatmul.mubr.msk.f32.vlgmr.msra.gmra.mrb[26].mxu0 %vm101_vm10, %v6115_v46  ;;  %v6142_v54 = vsel %vm2067_vm2, %v2061_v53, %v6056_v32  ;;  %v4218_v32 = vld [vmem:[%s6485_s1 + $0x20] sm:$0xff] }
 0x42b   :  { %4838 = vmatmul.mubr.msk.f32.vlgmr.msra.gmra.mrb[26].mxu1 %vm101_vm10, %v6142_v54  ;;  %5252 = vmatpush3.bf16.msra.mxu0 %v5760_v33 }
 0x42c   :  { %5258 = vmatpush3.bf16.msra.mxu1 %v5773_v37  ;;  %5253 = vmatprep.subr.bf16.mxu0 %v5550_v0 }
 0x42d   :  { %5259 = vmatprep.subr.bf16.mxu1 %v5550_v0  ;;  %4848 = vmatprep.mubr.msk.f32.mxu0 %vm5551_vm0, %v5552_v8 }
 0x42e   :  { %4859 = vmatprep.mubr.msk.f32.mxu1 %vm5551_vm0, %v5552_v8 }
 0x42f   :  { %5255 = vmatpush3.bf16.msra.mxu0 %v5784_v40 }
 0x430   :  { %5261 = vmatpush3.bf16.msra.mxu1 %v5792_v42  ;;  %5262 = vmatprep.subr.bf16.mxu0 %v5550_v0 }
 0x431   :  { %5268 = vmatprep.subr.bf16.mxu1 %v5550_v0 }
 0x432   :  { %4849 = vmatmul.mubr.msk.f32.vlgmr.msra.gmra.mrb[28].mxu0 %vm101_vm10, %v6142_v54 }
 0x433   :  { %4860 = vmatmul.mubr.msk.f32.vlgmr.msra.gmra.mrb[28].mxu1 %vm101_vm10, %v6142_v54  ;;  %5264 = vmatpush3.bf16.msra.mxu0 %v5660_v4 }
 0x434   :  { %5270 = vmatpush3.bf16.msra.mxu1 %v5675_v9  ;;  %5265 = vmatprep.subr.bf16.mxu0 %v5550_v0 }
 0x435   :  { %5271 = vmatprep.subr.bf16.mxu1 %v5550_v0  ;;  %4870 = vmatprep.mubr.msk.f32.mxu0 %vm5551_vm0, %v5552_v8 }
 0x436   :  { %4881 = vmatprep.mubr.msk.f32.mxu1 %vm5551_vm0, %v5552_v8 }
 0x437   :  { %5267 = vmatpush3.bf16.msra.mxu0 %v5686_v13 }
 0x438   :  { %5273 = vmatpush3.bf16.msra.mxu1 %v5690_v14  ;;  %5274 = vmatprep.subr.bf16.mxu0 %v5550_v0 }
 0x439   :  { %5280 = vmatprep.subr.bf16.mxu1 %v5550_v0 }
 0x4f5   :  { %v2144_v55 = vpop.f32.mrb[24].mxu0  ;;  %v2221_v58 = vpop.f32.mrb[24].mxu1 }
 0x4f6   :  { %v2148_v60 = vadd.f32 %v4218_v32, %v2144_v55  ;;  %v4806_v62 = vpop.f32.mrb[25].mxu0  ;;  %v4817_v63 = vpop.f32.mrb[25].mxu1  ;;  %v2225_v3 = vadd.f32 %v4219_v61, %v2221_v58  ;;  %v4228_v55 = vld [vmem:[%s6492_s6 + $0x18] sm:$0xff] }
 0x4f8   :  { %v4222_v2 = vmul.f32 -1.442695, %v2148_v60  ;;  %v4224_v5 = vmul.f32 -1.442695, %v2225_v3 }
 0x4fa   :  { %5468 = vpow2.f32 %v4222_v2 }
 0x4fb   :  { %5470 = vpow2.f32 %v4224_v5 }
 0x4fd   :  { %v2298_v7 = vpop.f32.mrb[26].mxu0 }
 0x4fe   :  { %v4828_v57 = vpop.f32.mrb[27].mxu0  ;;  %v2385_v11 = vpop.f32.mrb[26].mxu1  ;;  %v2299_v43 = vadd.f32 %v5839_v18, %v2298_v7 }
 0x4ff   :  { %v2389_v12 = vadd.f32 %v4226_v50, %v2385_v11  ;;  %v4839_v15 = vpop.f32.mrb[27].mxu1 }
 0x501   :  { %v4230_v16 = vmul.f32 -1.442695, %v2389_v12 }
 0x503   :  { %5472 = vpow2.f32 %v4230_v16  ;;  %v4235_v16 = vld [vmem:[%s6486_s2 + $0x28] sm:$0xff] }
 0x504   :  { %v5469_v22 = vpop.eup %5468 }
 0x505   :  { %v2152_v24 = vadd.f32 1.0, %v5469_v22  ;;  %v2462_v25 = vpop.f32.mrb[28].mxu0  ;;  %v5471_v35 = vpop.eup %5470 }
 0x506   :  { %v2466_v1 = vadd.f32 %v4227_v21, %v2462_v25  ;;  %v2539_v27 = vpop.f32.mrb[28].mxu1  ;;  %v4850_v30 = vpop.f32.mrb[29].mxu0  ;;  %v2229_v38 = vadd.f32 1.0, %v5471_v35 }
 0x507   :  { %5474 = vrcp.f32 %v2152_v24  ;;  %v4861_v10 = vpop.f32.mrb[29].mxu1  ;;  %v2540_v53 = vadd.f32 %v5848_v31, %v2539_v27 }
 0x508   :  { %v4232_v34 = vmul.f32 -1.442695, %v2466_v1  ;;  %v4242_v1 = vld [vmem:[%s6487_s4 + $0x10] sm:$0xff] }
 0x50a   :  { %5476 = vpow2.f32 %v4232_v34 }
 0x50d   :  { %v5473_v36 = vpop.eup %5472 }
 0x50e   :  { %v2393_v41 = vadd.f32 1.0, %v5473_v36 }
 0x510   :  { %5478 = vrcp.f32 %v2393_v41  ;;  %v4243_v41 = vld [vmem:[%s6488_s5 + $0x10] sm:$0xff] }
 0x511   :  { %v5475_v44 = vpop.eup %5474  ;;  %5480 = vrcp.f32 %v2229_v38 }
 0x512   :  { %v2302_v48 = vmul.f32 %v5475_v44, %v2299_v43 }
 0x514   :  { %v5477_v49 = vpop.eup %5476  ;;  %v2303_v51 = vadd.f32 %v4220_v45, %v2302_v48 }
 0x515   :  { %v2470_v52 = vadd.f32 1.0, %v5477_v49 }
 0x516   :  { %5482 = vtanh.f32 %v2303_v51 }
 0x517   :  { %5484 = vrcp.f32 %v2470_v52 }
 0x51a   :  { %v5479_v32 = vpop.eup %5478 }
 0x51b   :  { %v2543_v18 = vmul.f32 %v5479_v32, %v2540_v53  ;;  %v5481_v58 = vpop.eup %5480 }
 0x51c   :  { %v2305_v61 = vsub.f32 1.0, %v5481_v58  ;;  %v2307_v2 = vmul.f32 %v5481_v58, %v6115_v46 }
 0x51d   :  { %v2544_v60 = vadd.f32 %v4228_v55, %v2543_v18 }
 0x51f   :  { %5486 = vtanh.f32 %v2544_v60  ;;  %v6269_v60 = vld [vmem:[%s6489_s10] ss:$0 sm:$0xff] }
 0x520   :  { %v5483_v62 = vpop.eup %5482 }
 0x521   :  { %v2306_v63 = vmul.f32 %v5483_v62, %v2305_v61  ;;  %v5485_v50 = vpop.eup %5484 }
 0x522   :  { %v2546_v5 = vsub.f32 1.0, %v5485_v50  ;;  %v2548_v23 = vmul.f32 %v5485_v50, %v6142_v54 }
 0x523   :  { %v2308_v3 = vadd.f32 %v2307_v2, %v2306_v63  ;;  %v4236_v63 = vld [vmem:[%s6490_s3 + $0x28] sm:$0xff] }
 0x525   :  { %v6198_v31 = vsel %vm2067_vm2, %v2308_v3, %v6115_v46 }
 0x526   :  { %4871 = vmatmul.mubr.msk.f32.vlgmr.msra.gmra.mrb[30].mxu0 %vm101_vm10, %v6198_v31  ;;  %4882 = vmatmul.mubr.msk.f32.vlgmr.msra.gmra.mrb[30].mxu1 %vm101_vm10, %v6198_v31 }
 0x527   :  { %5276 = vmatpush3.bf16.msra.mxu0 %v5706_v19  ;;  %5282 = vmatpush3.bf16.msra.mxu1 %v5709_v20 }
 0x528   :  { %5277 = vmatprep.subr.bf16.mxu0 %v5550_v0  ;;  %5283 = vmatprep.subr.bf16.mxu1 %v5550_v0 }
 0x529   :  { %v5487_v7 = vpop.eup %5486  ;;  %4892 = vmatprep.mubr.msk.f32.mxu0 %vm5551_vm0, %v5552_v8  ;;  %4903 = vmatprep.mubr.msk.f32.mxu1 %vm5551_vm0, %v5552_v8 }
 0x52a   :  { %v2547_v46 = vmul.f32 %v5487_v7, %v2546_v5  ;;  %v6278_v7 = vld [vmem:[%s6491_s14] ss:$0 sm:$0xff] }
 0x52b   :  { %5279 = vmatpush3.bf16.msra.mxu0 %v5734_v26  ;;  %5285 = vmatpush3.bf16.msra.mxu1 %v5738_v28 }
 0x52c   :  { %5286 = vmatprep.subr.bf16.mxu0 %v5550_v0  ;;  %5292 = vmatprep.subr.bf16.mxu1 %v5550_v0  ;;  %v2549_v57 = vadd.f32 %v2548_v23, %v2547_v46 }
 0x52e   :  { %4893 = vmatmul.mubr.msk.f32.vlgmr.msra.gmra.mrb[32].mxu0 %vm101_vm10, %v6198_v31  ;;  %v6222_v11 = vsel %vm1820_vm1, %v2549_v57, %v6142_v54  ;;  %v4244_v57 = vld [vmem:[%s6492_s6 + $0x10] sm:$0xff] }
 0x52f   :  { %4904 = vmatmul.mubr.msk.f32.vlgmr.msra.gmra.mrb[32].mxu1 %vm101_vm10, %v6222_v11  ;;  %5288 = vmatpush3.bf16.msra.mxu0 %v5760_v33 }
 0x530   :  { %5294 = vmatpush3.bf16.msra.mxu1 %v5773_v37  ;;  %5289 = vmatprep.subr.bf16.mxu0 %v5550_v0 }
 0x531   :  { %5295 = vmatprep.subr.bf16.mxu1 %v5550_v0  ;;  %4914 = vmatprep.mubr.msk.f32.mxu0 %vm5551_vm0, %v5552_v8 }
 0x532   :  { %4925 = vmatprep.mubr.msk.f32.mxu1 %vm5551_vm0, %v5552_v8 }
 0x533   :  { %5291 = vmatpush3.bf16.msra.mxu0 %v5784_v40 }
 0x534   :  { %5297 = vmatpush3.bf16.msra.mxu1 %v5792_v42  ;;  %5298 = vmatprep.subr.bf16.mxu0 %v5550_v0 }
 0x535   :  { %5304 = vmatprep.subr.bf16.mxu1 %v5550_v0 }
 0x536   :  { %4915 = vmatmul.mubr.msk.f32.vlgmr.msra.gmra.mrb[34].mxu0 %vm101_vm10, %v6222_v11 }
 0x537   :  { %4926 = vmatmul.mubr.msk.f32.vlgmr.msra.gmra.mrb[34].mxu1 %vm101_vm10, %v6222_v11  ;;  %5300 = vmatpush3.bf16.msra.mxu0 %v5660_v4 }
 0x538   :  { %5306 = vmatpush3.bf16.msra.mxu1 %v5675_v9  ;;  %5301 = vmatprep.subr.bf16.mxu0 %v5550_v0 }
 0x539   :  { %5307 = vmatprep.subr.bf16.mxu1 %v5550_v0  ;;  %4936 = vmatprep.mubr.msk.f32.mxu0 %vm5551_vm0, %v5552_v8 }
 0x53a   :  { %4947 = vmatprep.mubr.msk.f32.mxu1 %vm5551_vm0, %v5552_v8 }
 0x53b   :  { %5303 = vmatpush3.bf16.msra.mxu0 %v5686_v13 }
 0x53c   :  { %5309 = vmatpush3.bf16.msra.mxu1 %v5690_v14  ;;  %5310 = vmatprep.subr.bf16.mxu0 %v5550_v0 }
 0x53d   :  { %5316 = vmatprep.subr.bf16.mxu1 %v5550_v0 }
 0x5f9   :  { %v2626_v54 = vpop.f32.mrb[30].mxu0  ;;  %v2703_v12 = vpop.f32.mrb[30].mxu1 }
 0x5fa   :  { %v2630_v15 = vadd.f32 %v4234_v39, %v2626_v54  ;;  %v4872_v21 = vpop.f32.mrb[31].mxu0  ;;  %v4883_v22 = vpop.f32.mrb[31].mxu1  ;;  %v2707_v25 = vadd.f32 %v4235_v16, %v2703_v12 }
 0x5fc   :  { %v4238_v24 = vmul.f32 -1.442695, %v2630_v15  ;;  %v4240_v27 = vmul.f32 -1.442695, %v2707_v25 }
 0x5fe   :  { %5488 = vpow2.f32 %v4238_v24 }
 0x5ff   :  { %5490 = vpow2.f32 %v4240_v27 }
 0x601   :  { %v2780_v30 = vpop.f32.mrb[32].mxu0 }
 0x602   :  { %v4894_v10 = vpop.f32.mrb[33].mxu0  ;;  %v2867_v34 = vpop.f32.mrb[32].mxu1  ;;  %v2781_v61 = vadd.f32 %v6269_v60, %v2780_v30 }
 0x603   :  { %v2871_v35 = vadd.f32 %v4242_v1, %v2867_v34  ;;  %v4905_v36 = vpop.f32.mrb[33].mxu1 }
 0x605   :  { %v4246_v38 = vmul.f32 -1.442695, %v2871_v35  ;;  %v4251_v35 = vld [vmem:[%s6486_s2 + $0x30] sm:$0xff] }
 0x607   :  { %5492 = vpow2.f32 %v4246_v38 }
 0x608   :  { %v5489_v43 = vpop.eup %5488 }
 0x609   :  { %v2634_v44 = vadd.f32 1.0, %v5489_v43  ;;  %v2944_v45 = vpop.f32.mrb[34].mxu0  ;;  %v5491_v32 = vpop.eup %5490 }
 0x60a   :  { %v2948_v48 = vadd.f32 %v4243_v41, %v2944_v45  ;;  %v3021_v49 = vpop.f32.mrb[34].mxu1  ;;  %v4916_v51 = vpop.f32.mrb[35].mxu0  ;;  %v2711_v18 = vadd.f32 1.0, %v5491_v32 }
 0x60b   :  { %5494 = vrcp.f32 %v2634_v44  ;;  %v4927_v52 = vpop.f32.mrb[35].mxu1  ;;  %v3022_v46 = vadd.f32 %v6278_v7, %v3021_v49 }
 0x60c   :  { %v4248_v53 = vmul.f32 -1.442695, %v2948_v48 }
 0x60e   :  { %5496 = vpow2.f32 %v4248_v53  ;;  %v4259_v53 = vld [vmem:[%s6488_s5 + $0x8] sm:$0xff] }
 0x611   :  { %v5493_v55 = vpop.eup %5492 }
 0x612   :  { %v2875_v58 = vadd.f32 1.0, %v5493_v55 }
 0x614   :  { %5498 = vrcp.f32 %v2875_v58 }
 0x615   :  { %v5495_v62 = vpop.eup %5494  ;;  %5500 = vrcp.f32 %v2711_v18 }
 0x616   :  { %v2784_v2 = vmul.f32 %v5495_v62, %v2781_v61 }
 0x618   :  { %v5497_v3 = vpop.eup %5496  ;;  %v2785_v50 = vadd.f32 %v4236_v63, %v2784_v2 }
 0x619   :  { %v2952_v5 = vadd.f32 1.0, %v5497_v3 }
 0x61a   :  { %5502 = vtanh.f32 %v2785_v50 }
 0x61b   :  { %5504 = vrcp.f32 %v2952_v5 }
 0x61e   :  { %v5499_v23 = vpop.eup %5498 }
 0x61f   :  { %v3025_v39 = vmul.f32 %v5499_v23, %v3022_v46  ;;  %v5501_v54 = vpop.eup %5500 }
 0x620   :  { %v2787_v15 = vsub.f32 1.0, %v5501_v54  ;;  %v2789_v22 = vmul.f32 %v5501_v54, %v6198_v31 }
 0x621   :  { %v3026_v12 = vadd.f32 %v4244_v57, %v3025_v39  ;;  %v4252_v39 = vld [vmem:[%s6490_s3 + $0x30] sm:$0xff] }
 0x623   :  { %5506 = vtanh.f32 %v3026_v12 }
 0x624   :  { %v5503_v16 = vpop.eup %5502 }
 0x625   :  { %v2788_v21 = vmul.f32 %v5503_v16, %v2787_v15  ;;  %v5505_v25 = vpop.eup %5504 }
 0x626   :  { %v3028_v27 = vsub.f32 1.0, %v5505_v25 }
 0x627   :  { %v2790_v24 = vadd.f32 %v2789_v22, %v2788_v21 }
 0x629   :  { %v6288_v1 = vsel %vm1573_vm15, %v2790_v24, %v6198_v31  ;;  %v3030_v31 = vmul.f32 %v5505_v25, %v6222_v11  ;;  %v4260_v24 = vld [vmem:[%s6492_s6 + $0x8] sm:$0xff] }
 0x62a   :  { %4937 = vmatmul.mubr.msk.f32.vlgmr.msra.gmra.mrb[36].mxu0 %vm101_vm10, %v6288_v1  ;;  %4948 = vmatmul.mubr.msk.f32.vlgmr.msra.gmra.mrb[36].mxu1 %vm101_vm10, %v6288_v1 }
 0x62b   :  { %5312 = vmatpush3.bf16.msra.mxu0 %v5706_v19  ;;  %5318 = vmatpush3.bf16.msra.mxu1 %v5709_v20 }
 0x62c   :  { %5313 = vmatprep.subr.bf16.mxu0 %v5550_v0  ;;  %5319 = vmatprep.subr.bf16.mxu1 %v5550_v0 }
 0x62d   :  { %v5507_v30 = vpop.eup %5506  ;;  %4958 = vmatprep.mubr.msk.f32.mxu0 %vm5551_vm0, %v5552_v8  ;;  %4969 = vmatprep.mubr.msk.f32.mxu1 %vm5551_vm0, %v5552_v8 }
 0x62e   :  { %v3029_v29 = vmul.f32 %v5507_v30, %v3028_v27 }
 0x62f   :  { %5315 = vmatpush3.bf16.msra.mxu0 %v5734_v26  ;;  %5321 = vmatpush3.bf16.msra.mxu1 %v5738_v28 }
 0x630   :  { %5322 = vmatprep.subr.bf16.mxu0 %v5550_v0  ;;  %5328 = vmatprep.subr.bf16.mxu1 %v5550_v0  ;;  %v3031_v10 = vadd.f32 %v3030_v31, %v3029_v29 }
 0x632   :  { %4959 = vmatmul.mubr.msk.f32.vlgmr.msra.gmra.mrb[38].mxu0 %vm101_vm10, %v6288_v1  ;;  %v6312_v34 = vsel %vm1326_vm14, %v3031_v10, %v6222_v11 }
 0x633   :  { %4970 = vmatmul.mubr.msk.f32.vlgmr.msra.gmra.mrb[38].mxu1 %vm101_vm10, %v6312_v34  ;;  %5324 = vmatpush3.bf16.msra.mxu0 %v5760_v33 }
 0x634   :  { %5330 = vmatpush3.bf16.msra.mxu1 %v5773_v37  ;;  %5325 = vmatprep.subr.bf16.mxu0 %v5550_v0 }
 0x635   :  { %5331 = vmatprep.subr.bf16.mxu1 %v5550_v0  ;;  %4980 = vmatprep.mubr.msk.f32.mxu0 %vm5551_vm0, %v5552_v8 }
 0x636   :  { %4991 = vmatprep.mubr.msk.f32.mxu1 %vm5551_vm0, %v5552_v8 }
 0x637   :  { %5327 = vmatpush3.bf16.msra.mxu0 %v5784_v40 }
 0x638   :  { %5333 = vmatpush3.bf16.msra.mxu1 %v5792_v42  ;;  %5334 = vmatprep.subr.bf16.mxu0 %v5550_v0 }
 0x639   :  { %5340 = vmatprep.subr.bf16.mxu1 %v5550_v0 }
 0x63a   :  { %4981 = vmatmul.mubr.msk.f32.vlgmr.msra.gmra.mrb[40].mxu0 %vm101_vm10, %v6312_v34 }
 0x63b   :  { %4992 = vmatmul.mubr.msk.f32.vlgmr.msra.gmra.mrb[40].mxu1 %vm101_vm10, %v6312_v34  ;;  %5336 = vmatpush3.bf16.msra.mxu0 %v5660_v4  ;;  %v4250_v4 = vld [vmem:[%s6485_s1 + $0x30] sm:$0xff] }
 0x63c   :  { %5342 = vmatpush3.bf16.msra.mxu1 %v5675_v9  ;;  %5337 = vmatprep.subr.bf16.mxu0 %v5550_v0 }
 0x63d   :  { %5343 = vmatprep.subr.bf16.mxu1 %v5550_v0  ;;  %5002 = vmatprep.mubr.msk.f32.mxu0 %vm5551_vm0, %v5552_v8 }
 0x63e   :  { %5013 = vmatprep.mubr.msk.f32.mxu1 %vm5551_vm0, %v5552_v8 }
 0x63f   :  { %5339 = vmatpush3.bf16.msra.mxu0 %v5686_v13 }
 0x640   :  { %5345 = vmatpush3.bf16.msra.mxu1 %v5690_v14  ;;  %5346 = vmatprep.subr.bf16.mxu0 %v5550_v0  ;;  %v4258_v14 = vld [vmem:[%s6487_s4 + $0x8] sm:$0xff] }
 0x641   :  { %5352 = vmatprep.subr.bf16.mxu1 %v5550_v0 }
 0x6fd   :  { %v3108_v9 = vpop.f32.mrb[36].mxu0  ;;  %v3185_v17 = vpop.f32.mrb[36].mxu1 }
 0x6fe   :  { %v3112_v11 = vadd.f32 %v4250_v4, %v3108_v9  ;;  %v4938_v36 = vpop.f32.mrb[37].mxu0  ;;  %v4949_v38 = vpop.f32.mrb[37].mxu1  ;;  %v3189_v41 = vadd.f32 %v4251_v35, %v3185_v17 }
 0x700   :  { %v4254_v13 = vmul.f32 -1.442695, %v3112_v11  ;;  %v4256_v43 = vmul.f32 -1.442695, %v3189_v41 }
 0x702   :  { %5508 = vpow2.f32 %v4254_v13  ;;  %v3997_v13 = vld [vmem:[%s6494_s15 + $0x18] sm:$0xff] }
 0x703   :  { %5510 = vpow2.f32 %v4256_v43 }
 0x705   :  { %v3262_v44 = vpop.f32.mrb[38].mxu0 }
 0x706   :  { %v4960_v45 = vpop.f32.mrb[39].mxu0  ;;  %v3349_v48 = vpop.f32.mrb[38].mxu1  ;;  %v3263_v23 = vadd.f32 %v6269_v60, %v3262_v44 }
 0x707   :  { %v3353_v49 = vadd.f32 %v4258_v14, %v3349_v48  ;;  %v4971_v51 = vpop.f32.mrb[39].mxu1  ;;  %v4266_v14 = vld [vmem:[%s6485_s1 + $0x38] sm:$0xff] }
 0x708   :  { %v4267_v48 = vld [vmem:[%s6486_s2 + $0x38] sm:$0xff] }
 0x709   :  { %v4262_v52 = vmul.f32 -1.442695, %v3353_v49 }
 0x70b   :  { %5512 = vpow2.f32 %v4262_v52 }
 0x70c   :  { %v5509_v32 = vpop.eup %5508 }
 0x70d   :  { %v3116_v55 = vadd.f32 1.0, %v5509_v32  ;;  %v3426_v18 = vpop.f32.mrb[40].mxu0  ;;  %v5511_v3 = vpop.eup %5510 }
 0x70e   :  { %v3430_v58 = vadd.f32 %v4259_v53, %v3426_v18  ;;  %v3503_v61 = vpop.f32.mrb[40].mxu1  ;;  %v4982_v62 = vpop.f32.mrb[41].mxu0  ;;  %v3193_v5 = vadd.f32 1.0, %v5511_v3 }
 0x70f   :  { %5514 = vrcp.f32 %v3116_v55  ;;  %v4993_v63 = vpop.f32.mrb[41].mxu1  ;;  %v3504_v21 = vadd.f32 %v6278_v7, %v3503_v61 }
 0x710   :  { %v4264_v2 = vmul.f32 -1.442695, %v3430_v58 }
 0x712   :  { %5516 = vpow2.f32 %v4264_v2  ;;  %v3757_v2 = vld [vmem:[%s6488_s5] sm:$0xff] }
 0x715   :  { %v5513_v50 = vpop.eup %5512 }
 0x716   :  { %v3357_v46 = vadd.f32 1.0, %v5513_v50 }
 0x718   :  { %5518 = vrcp.f32 %v3357_v46 }
 0x719   :  { %v5515_v57 = vpop.eup %5514  ;;  %5520 = vrcp.f32 %v3193_v5 }
 0x71a   :  { %v3266_v54 = vmul.f32 %v5515_v57, %v3263_v23 }
 0x71c   :  { %v5517_v12 = vpop.eup %5516  ;;  %v3267_v15 = vadd.f32 %v4252_v39, %v3266_v54 }
 0x71d   :  { %v3434_v16 = vadd.f32 1.0, %v5517_v12 }
 0x71e   :  { %5522 = vtanh.f32 %v3267_v15 }
 0x71f   :  { %5524 = vrcp.f32 %v3434_v16 }
 0x722   :  { %v5519_v22 = vpop.eup %5518 }
 0x723   :  { %v3507_v25 = vmul.f32 %v5519_v22, %v3504_v21  ;;  %v5521_v27 = vpop.eup %5520 }
 0x724   :  { %v3269_v29 = vsub.f32 1.0, %v5521_v27  ;;  %v3271_v4 = vmul.f32 %v5521_v27, %v6288_v1 }
 0x725   :  { %v3508_v30 = vadd.f32 %v4260_v24, %v3507_v25  ;;  %v4268_v25 = vld [vmem:[%s6490_s3 + $0x38] sm:$0xff] }
 0x727   :  { %5526 = vtanh.f32 %v3508_v30 }
 0x728   :  { %v5523_v31 = vpop.eup %5522 }
 0x729   :  { %v3270_v10 = vmul.f32 %v5523_v31, %v3269_v29  ;;  %v5525_v17 = vpop.eup %5524 }
 0x72a   :  { %v3510_v35 = vsub.f32 1.0, %v5525_v17 }
 0x72b   :  { %v3272_v9 = vadd.f32 %v3271_v4, %v3270_v10 }
 0x72d   :  { %v6368_v11 = vsel %vm1079_vm13, %v3272_v9, %v6288_v1  ;;  %v3512_v1 = vmul.f32 %v5525_v17, %v6312_v34  ;;  %v3758_v9 = vld [vmem:[%s6492_s6] sm:$0xff] }
 0x72e   :  { %5003 = vmatmul.mubr.msk.f32.vlgmr.msra.gmra.mrb[42].mxu0 %vm101_vm10, %v6368_v11  ;;  %5014 = vmatmul.mubr.msk.f32.vlgmr.msra.gmra.mrb[42].mxu1 %vm101_vm10, %v6368_v11 }
 0x72f   :  { %5348 = vmatpush3.bf16.msra.mxu0 %v5706_v19  ;;  %5354 = vmatpush3.bf16.msra.mxu1 %v5709_v20 }
 0x730   :  { %5349 = vmatprep.subr.bf16.mxu0 %v5550_v0  ;;  %5355 = vmatprep.subr.bf16.mxu1 %v5550_v0 }
 0x731   :  { %v5527_v36 = vpop.eup %5526  ;;  %5024 = vmatprep.mubr.msk.f32.mxu0 %vm5551_vm0, %v5552_v8  ;;  %5035 = vmatprep.mubr.msk.f32.mxu1 %vm5551_vm0, %v5552_v8 }
 0x732   :  { %v3511_v6 = vmul.f32 %v5527_v36, %v3510_v35 }
 0x733   :  { %5351 = vmatpush3.bf16.msra.mxu0 %v5734_v26  ;;  %5357 = vmatpush3.bf16.msra.mxu1 %v5738_v28  ;;  %v3998_v26 = vld [vmem:[%s6493_s16] sm:$0xff]  ;;  %v3999_v28 = vld [vmem:[%s6493_s16 + $0x8] sm:$0xff] }
 0x734   :  { %5358 = vmatprep.subr.bf16.mxu0 %v5550_v0  ;;  %5364 = vmatprep.subr.bf16.mxu1 %v5550_v0  ;;  %v3513_v19 = vadd.f32 %v3512_v1, %v3511_v6 }
 0x736   :  { %5025 = vmatmul.mubr.msk.f32.vlgmr.msra.gmra.mrb[44].mxu0 %vm101_vm10, %v6368_v11  ;;  %v6392_v20 = vsel %vm832_vm12, %v3513_v19, %v6312_v34  ;;  %v3996_v34 = vld [vmem:[%s6494_s15 + $0x10] sm:$0xff] }
 0x737   :  { %5036 = vmatmul.mubr.msk.f32.vlgmr.msra.gmra.mrb[44].mxu1 %vm101_vm10, %v6392_v20  ;;  %5360 = vmatpush3.bf16.msra.mxu0 %v5760_v33  ;;  %v5371_v33 = vpack.c.bf16 %v3999_v28, %v3998_v26  ;;  %v5380_v41 = vpack.c.bf16 %v3997_v13, %v3996_v34 }
 0x738   :  { %5366 = vmatpush3.bf16.msra.mxu1 %v5773_v37  ;;  %5361 = vmatprep.subr.bf16.mxu0 %v5550_v0  ;;  %v4000_v37 = vld [vmem:[%s6493_s16 + $0x10] sm:$0xff] }
 0x739   :  { %5367 = vmatprep.subr.bf16.mxu1 %v5550_v0  ;;  %5046 = vmatprep.mubr.msk.f32.mxu0 %vm5551_vm0, %v5552_v8 }
 0x73a   :  { %5057 = vmatprep.mubr.msk.f32.mxu1 %vm5551_vm0, %v5552_v8 }
 0x73b   :  { %5363 = vmatpush3.bf16.msra.mxu0 %v5784_v40  ;;  %v4001_v40 = vld [vmem:[%s6493_s16 + $0x18] sm:$0xff] }
 0x73c   :  { %5369 = vmatpush3.bf16.msra.mxu1 %v5792_v42  ;;  %5370 = vmatprep.subr.bf16.mxu0 %v5550_v0  ;;  %v5374_v42 = vpack.c.bf16 %v4001_v40, %v4000_v37 }
 0x73d   :  { %5376 = vmatprep.subr.bf16.mxu1 %v5550_v0 }
 0x73e   :  { %5047 = vmatmul.mubr.msk.f32.vlgmr.msra.gmra.mrb[46].mxu0 %vm101_vm10, %v6392_v20 }
 0x73f   :  { %5058 = vmatmul.mubr.msk.f32.vlgmr.msra.gmra.mrb[46].mxu1 %vm101_vm10, %v6392_v20  ;;  %5068 = vmatprep.mubr.msk.f32.mxu0 %vm5551_vm0, %v5552_v8 }
 0x740   :  { %5079 = vmatprep.mubr.msk.f32.mxu1 %vm5551_vm0, %v5552_v8  ;;  %5372 = vmatpush3.bf16.msra.mxu0 %v5371_v33  ;;  %v3994_v8 = vld [vmem:[%s6494_s15] sm:$0xff] }
 0x741   :  { %5373 = vmatprep.subr.bf16.mxu0 %v5550_v0  ;;  %v5377_v38 = vpack.c.bf16 %v3995_v59, %v3994_v8 }
 0x743   :  { %5378 = vmatpush3.bf16.msra.mxu1 %v5377_v38 }
 0x744   :  { %5375 = vmatpush3.bf16.msra.mxu0 %v5374_v42  ;;  %5379 = vmatprep.subr.bf16.mxu1 %v5550_v0  ;;  %v3756_v0 = vld [vmem:[%s6487_s4] sm:$0xff] }
 0x747   :  { %5381 = vmatpush3.bf16.msra.mxu1 %v5380_v41 }
 0x801   :  { %v3590_v43 = vpop.f32.mrb[42].mxu0  ;;  %v3667_v44 = vpop.f32.mrb[42].mxu1 }
 0x802   :  { %v3594_v45 = vadd.f32 %v4266_v14, %v3590_v43  ;;  %v5004_v49 = vpop.f32.mrb[43].mxu0  ;;  %v5015_v51 = vpop.f32.mrb[43].mxu1  ;;  %v3671_v53 = vadd.f32 %v4267_v48, %v3667_v44 }
 0x804   :  { %v4270_v52 = vmul.f32 -1.442695, %v3594_v45  ;;  %v4272_v32 = vmul.f32 -1.442695, %v3671_v53 }
 0x806   :  { %5528 = vpow2.f32 %v4270_v52 }
 0x807   :  { %5530 = vpow2.f32 %v4272_v32 }
 0x809   :  { %v3744_v55 = vpop.f32.mrb[44].mxu0 }
 0x80a   :  { %v5026_v18 = vpop.f32.mrb[45].mxu0  ;;  %v3828_v58 = vpop.f32.mrb[44].mxu1  ;;  %v3745_v22 = vadd.f32 %v6269_v60, %v3744_v55 }
 0x80b   :  { %v3832_v61 = vadd.f32 %v3828_v58, %v3756_v0  ;;  %v5037_v62 = vpop.f32.mrb[45].mxu1 }
 0x80d   :  { %v4275_v63 = vmul.f32 -1.442695, %v3832_v61 }
 0x80f   :  { %5532 = vpow2.f32 %v4275_v63 }
 0x810   :  { %v5529_v3 = vpop.eup %5528 }
 0x811   :  { %v3598_v50 = vadd.f32 1.0, %v5529_v3  ;;  %v3905_v5 = vpop.f32.mrb[46].mxu0  ;;  %v5531_v12 = vpop.eup %5530 }
 0x812   :  { %v3909_v46 = vadd.f32 %v3905_v5, %v3757_v2  ;;  %v3982_v23 = vpop.f32.mrb[46].mxu1  ;;  %v5048_v57 = vpop.f32.mrb[47].mxu0  ;;  %v3675_v16 = vadd.f32 1.0, %v5531_v12 }
 0x813   :  { %5534 = vrcp.f32 %v3598_v50  ;;  %v5059_v39 = vpop.f32.mrb[47].mxu1  ;;  %v3983_v10 = vadd.f32 %v6278_v7, %v3982_v23 }
 0x814   :  { %v4277_v54 = vmul.f32 -1.442695, %v3909_v46 }
 0x816   :  { %5536 = vpow2.f32 %v4277_v54 }
 0x819   :  { %v5533_v15 = vpop.eup %5532 }
 0x81a   :  { %v3836_v21 = vadd.f32 1.0, %v5533_v15 }
 0x81c   :  { %5538 = vrcp.f32 %v3836_v21 }
 0x81d   :  { %v5535_v24 = vpop.eup %5534  ;;  %5540 = vrcp.f32 %v3675_v16 }
 0x81e   :  { %v3748_v27 = vmul.f32 %v5535_v24, %v3745_v22 }
 0x820   :  { %v5537_v30 = vpop.eup %5536  ;;  %v3749_v29 = vadd.f32 %v4268_v25, %v3748_v27 }
 0x821   :  { %v3913_v31 = vadd.f32 1.0, %v5537_v30 }
 0x822   :  { %5542 = vtanh.f32 %v3749_v29 }
 0x823   :  { %5544 = vrcp.f32 %v3913_v31 }
 0x826   :  { %v5539_v4 = vpop.eup %5538 }
 0x827   :  { %v3986_v60 = vmul.f32 %v5539_v4, %v3983_v10  ;;  %v5541_v17 = vpop.eup %5540 }
 0x828   :  { %v3751_v36 = vsub.f32 1.0, %v5541_v17  ;;  %v3753_v19 = vmul.f32 %v5541_v17, %v6368_v11 }
 0x829   :  { %v3987_v35 = vadd.f32 %v3986_v60, %v3758_v9 }
 0x82b   :  { %5546 = vtanh.f32 %v3987_v35 }
 0x82c   :  { %v5543_v6 = vpop.eup %5542 }
 0x82d   :  { %v3752_v1 = vmul.f32 %v5543_v6, %v3751_v36  ;;  %v5545_v28 = vpop.eup %5544 }
 0x82e   :  { %v3989_v33 = vsub.f32 1.0, %v5545_v28  ;;  %v3991_v42 = vmul.f32 %v5545_v28, %v6392_v20 }
 0x82f   :  { %v3754_v26 = vadd.f32 %v3753_v19, %v3752_v1 }
 0x831   :  { %v3755_v7 = vsel %vm585_vm11, %v3754_v26, %v6368_v11 }
 0x832   :  { %5069 = vmatmul.mubr.msk.f32.vlgmr.msra.gmra.mrb[48].mxu0 %vm101_vm10, %v3755_v7 }
 0x835   :  { %v5547_v37 = vpop.eup %5546 }
 0x836   :  { %v3990_v40 = vmul.f32 %v5547_v37, %v3989_v33 }
 0x838   :  { %v3992_v8 = vadd.f32 %v3991_v42, %v3990_v40 }
 0x83a   :  { %v3993_v59 = vsel %vm341_vm9, %v3992_v8, %v6392_v20 }
 0x83b   :  { %5080 = vmatmul.mubr.msk.f32.vlgmr.msra.gmra.mrb[48].mxu1 %vm101_vm10, %v3993_v59 }
 0x905   :  { %v4071_v34 = vpop.f32.mrb[48].mxu0 }
 0x906   :  { %v5070_v38 = vpop.f32.mrb[49].mxu0 }
 0x90e   :  { %v4144_v13 = vpop.f32.mrb[48].mxu1 }
 0x90f   :  { %v4145_v11 = vadd.f32 %v4144_v13, %v4071_v34  ;;  %v5081_v41 = vpop.f32.mrb[49].mxu1 }
 0x911   :  { %v4155_v14 = vadd.f32 %v4281_v56, %v4145_v11 }
 0x913   :  { %4156 = vst [vmem:[%s6496_s18] sm:$0xff] %v4155_v14 }

</bundles_post_ra>
